<compile_context>
chip_gen: v5e
topology: v5e:2x2
jax: 0.10.0
libtpu: 0.0.40
codegen_flags: <defaults>
</compile_context>

<pallas_src>
import functools
import jax
import jax.numpy as jnp
from jax.experimental import pallas as pl
from jax.experimental.pallas import tpu as pltpu


# ---------------------------------------------------------------------------
# Kernel 1: fused LeakyReLU(0.2) + Conv2d(4,4,s2,p1,bias=False) + BN partial stats
# ---------------------------------------------------------------------------
def _down_conv_kernel(xs_ref, w_ref, y_ref, stat_ref, *, ho, wo, alpha):
    xs = xs_ref[0]                                    # (Ho+1, Wo+1, 4*Cin) f32
    xs = jnp.where(xs > 0, xs, alpha * xs)            # activation once per input pixel
    # 2x2 window over the space-to-depth view == original 4x4/s2 conv patches.
    patch = jnp.concatenate(
        [xs[0:ho, 0:wo, :], xs[0:ho, 1:wo + 1, :],
         xs[1:ho + 1, 0:wo, :], xs[1:ho + 1, 1:wo + 1, :]], axis=-1)
    patch = patch.astype(jnp.bfloat16).reshape(ho * wo, patch.shape[-1])
    y = jnp.dot(patch, w_ref[...], preferred_element_type=jnp.float32)   # (M, Cout)
    y_ref[0] = y.reshape(ho, wo, y.shape[-1])
    s = jnp.sum(y, axis=0, keepdims=True)             # per-image BN partials
    q = jnp.sum(y * y, axis=0, keepdims=True)
    stat_ref[0] = jnp.concatenate([s, q], axis=0)     # (2, Cout)


# ---------------------------------------------------------------------------
# Kernel 2: fused [down-BN apply + light add (submodule stub) + ReLU] +
#           phase-decomposed ConvTranspose2d(4,4,s2,p1,bias=False) + BN2 partials
# ---------------------------------------------------------------------------
def _up_convT_kernel(y_ref, s_ref, t_ref, light_ref, w_ref, z_ref, stat_ref,
                     hp_ref, *, ho, wo, cin, cout):
    y = y_ref[0]                                                 # (Ho, Wo, Cin) f32
    h = y * s_ref[0] + t_ref[0] + light_ref[0, 0]                # BN apply + light
    h = jnp.maximum(h, 0.0)                                      # ReLU
    # zero-padded copy in VMEM (halo of 1 for the phase windows)
    hp_ref[...] = jnp.zeros(hp_ref.shape, hp_ref.dtype)
    hp_ref[1:ho + 1, 1:wo + 1, :] = h

    s_acc = jnp.zeros((1, cout), jnp.float32)
    q_acc = jnp.zeros((1, cout), jnp.float32)
    for p in range(2):                      # output row phase
        halves = []
        for q in range(2):                  # output col phase
            terms = []
            for dih in range(2):
                rs = (1 - dih) if p == 0 else (1 + dih)
                for diw in range(2):
                    cs = (1 - diw) if q == 0 else (1 + diw)
                    terms.append(hp_ref[rs:rs + ho, cs:cs + wo, :])
            patch = jnp.concatenate(terms, axis=-1).astype(jnp.bfloat16)
            patch = patch.reshape(ho * wo, 4 * cin)
            zp = jnp.dot(patch, w_ref[2 * p + q],
                         preferred_element_type=jnp.float32)     # (M, Cout)
            s_acc += jnp.sum(zp, axis=0, keepdims=True)
            q_acc += jnp.sum(zp * zp, axis=0, keepdims=True)
            halves.append(zp.reshape(ho, wo, cout))
        # pack both column phases on the lane axis: (Ho, Wo, 2*Cout)
        z_ref[0, :, p, :, :] = jnp.concatenate(halves, axis=-1)
    stat_ref[0] = jnp.concatenate([s_acc, q_acc], axis=0)        # (2, Cout)


# ---------------------------------------------------------------------------
# Kernel 3: BN2 apply + layout to NCHW + concat([x_image, y_up2_2], channel)
#           (lane-dense stores: last dim = H*W)
# ---------------------------------------------------------------------------
def _finalize_kernel(z_ref, s_ref, t_ref, x_ref, o_ref, *, n_skip):
    zb = z_ref[0]                                    # (H*W, Cout) f32
    yb = zb * s_ref[...] + t_ref[...]                # BN2 scale/shift
    o_ref[0, 0:n_skip, :] = x_ref[0]                 # identity skip (Ci, H*W)
    o_ref[0, n_skip:, :] = yb.T                      # (Cout, H*W)


# ---------------- weight / input layout prep (tiny, one-time XLA glue) ------

def _space_to_depth2_pad1(x_nchw):
    x = jnp.transpose(x_nchw, (0, 2, 3, 1))                      # NHWC
    x = jnp.pad(x, ((0, 0), (1, 1), (1, 1), (0, 0)))
    b, hp, wp, c = x.shape
    x = x.reshape(b, hp // 2, 2, wp // 2, 2, c)
    x = jnp.transpose(x, (0, 1, 3, 2, 4, 5))
    return x.reshape(b, hp // 2, wp // 2, 4 * c)                 # (B, Ho+1, Wo+1, 4C)


def _down_weight_mat(w):
    # Conv2d weight (Cout, Cin, 4, 4) -> (16*Cin, Cout) matching the in-kernel patch order
    co, ci = w.shape[0], w.shape[1]
    w6 = w.reshape(co, ci, 2, 2, 2, 2)                # (co, c, a, dr, b, dc), kh=2a+dr, kw=2b+dc
    w6 = jnp.transpose(w6, (2, 4, 3, 5, 1, 0))        # (a, b, dr, dc, c, co)
    return w6.reshape(16 * ci, co).astype(jnp.bfloat16)


def _up_weight_phases(wt):
    # ConvTranspose2d weight (Cin, Cout, 4, 4) -> (4, 4*Cin, Cout), one 2x2 sub-kernel per phase
    phases = []
    for p in range(2):
        for q in range(2):
            terms = []
            for dih in range(2):
                kh = 1 + 2 * dih if p == 0 else 2 - 2 * dih
                for diw in range(2):
                    kw = 1 + 2 * diw if q == 0 else 2 - 2 * diw
                    terms.append(wt[:, :, kh, kw])               # (Cin, Cout)
            phases.append(jnp.concatenate(terms, axis=0))        # (4*Cin, Cout)
    return jnp.stack(phases, axis=0).astype(jnp.bfloat16)


# ---------------- module forward (innermost block, use_bias=False) ----------

def init_params(key, input_nc, inner_nc, outer_nc):
    k1, k2, k3, k4, k5, k6 = jax.random.split(key, 6)
    return {
        "w_down": jax.random.normal(k1, (inner_nc, input_nc, 4, 4), jnp.float32) * 0.05,
        "w_up": jax.random.normal(k2, (inner_nc, outer_nc, 4, 4), jnp.float32) * 0.05,
        "down_gamma": 1.0 + 0.1 * jax.random.normal(k3, (inner_nc,), jnp.float32),
        "down_beta": 0.1 * jax.random.normal(k4, (inner_nc,), jnp.float32),
        "up_gamma": 1.0 + 0.1 * jax.random.normal(k5, (outer_nc,), jnp.float32),
        "up_beta": 0.1 * jax.random.normal(k6, (outer_nc,), jnp.float32),
    }


def unet_block_forward(params, x_image_nchw, x_new_light, inner_nc, outer_nc, eps=1e-5):
    x = x_image_nchw.astype(jnp.float32)
    B, Ci, H, W = x.shape
    assert H % 2 == 0 and W % 2 == 0
    Ho, Wo = H // 2, W // 2

    # ---- down = [LeakyReLU(0.2), Conv2d(4,2,1,bias=False), BatchNorm2d(inner_nc)]
    xs = _space_to_depth2_pad1(x)                          # (B, Ho+1, Wo+1, 4*Ci)
    w_down = _down_weight_mat(params["w_down"])            # (16*Ci, inner) bf16
    y_raw, st1 = pl.pallas_call(
        functools.partial(_down_conv_kernel, ho=Ho, wo=Wo, alpha=0.2),
        grid=(B,),
        in_specs=[
            pl.BlockSpec((1, Ho + 1, Wo + 1, 4 * Ci), lambda b: (b, 0, 0, 0)),
            pl.BlockSpec((16 * Ci, inner_nc), lambda b: (0, 0)),
        ],
        out_specs=(
            pl.BlockSpec((1, Ho, Wo, inner_nc), lambda b: (b, 0, 0, 0)),
            pl.BlockSpec((1, 2, inner_nc), lambda b: (b, 0, 0)),
        ),
        out_shape=(
            jax.ShapeDtypeStruct((B, Ho, Wo, inner_nc), jnp.float32),
            jax.ShapeDtypeStruct((B, 2, inner_nc), jnp.float32),
        ),
        compiler_params=pltpu.CompilerParams(dimension_semantics=("parallel",)),
    )(xs, w_down)

    # BatchNorm2d(inner_nc) batch stats (training mode, biased variance) -> scale/shift
    cnt1 = float(B * Ho * Wo)
    mean1 = jnp.sum(st1[:, 0, :], axis=0) / cnt1
    var1 = jnp.maximum(jnp.sum(st1[:, 1, :], axis=0) / cnt1 - mean1 * mean1, 0.0)
    inv1 = jax.lax.rsqrt(var1 + eps)
    s1 = (params["down_gamma"] * inv1).reshape(1, inner_nc).astype(jnp.float32)
    t1 = (params["down_beta"] - mean1 * params["down_gamma"] * inv1).reshape(1, inner_nc).astype(jnp.float32)

    # ---- submodule (innermost) — TODO(synk): self.submodule is an external nn.Module
    # supplied at construction; deterministic stub (y_ori_light = light,
    # y_up = x_down + light broadcast) is fused into the up kernel below.
    y_ori_light = x_new_light
    light = x_new_light.astype(jnp.float32).reshape(B, 1, inner_nc)

    # ---- up2_2 = [ReLU, ConvTranspose2d(4,2,1,bias=False), BatchNorm2d(outer_nc)]
    w_up = _up_weight_phases(params["w_up"])               # (4, 4*inner, outer) bf16
    z, st2 = pl.pallas_call(
        functools.partial(_up_convT_kernel, ho=Ho, wo=Wo, cin=inner_nc, cout=outer_nc),
        grid=(B,),
        in_specs=[
            pl.BlockSpec((1, Ho, Wo, inner_nc), lambda b: (b, 0, 0, 0)),
            pl.BlockSpec((1, inner_nc), lambda b: (0, 0)),
            pl.BlockSpec((1, inner_nc), lambda b: (0, 0)),
            pl.BlockSpec((1, 1, inner_nc), lambda b: (b, 0, 0)),
            pl.BlockSpec((4, 4 * inner_nc, outer_nc), lambda b: (0, 0, 0)),
        ],
        out_specs=(
            pl.BlockSpec((1, Ho, 2, Wo, 2 * outer_nc), lambda b: (b, 0, 0, 0, 0)),
            pl.BlockSpec((1, 2, outer_nc), lambda b: (b, 0, 0)),
        ),
        out_shape=(
            jax.ShapeDtypeStruct((B, Ho, 2, Wo, 2 * outer_nc), jnp.float32),
            jax.ShapeDtypeStruct((B, 2, outer_nc), jnp.float32),
        ),
        scratch_shapes=[pltpu.VMEM((Ho + 2, Wo + 2, inner_nc), jnp.float32)],
        compiler_params=pltpu.CompilerParams(dimension_semantics=("parallel",)),
    )(y_raw, s1, t1, light, w_up)

    # BatchNorm2d(outer_nc) batch stats -> scale/shift
    cnt2 = float(B * H * W)
    mean2 = jnp.sum(st2[:, 0, :], axis=0) / cnt2
    var2 = jnp.maximum(jnp.sum(st2[:, 1, :], axis=0) / cnt2 - mean2 * mean2, 0.0)
    inv2 = jax.lax.rsqrt(var2 + eps)
    s2 = (params["up_gamma"] * inv2).reshape(1, outer_nc).astype(jnp.float32)
    t2 = (params["up_beta"] - mean2 * params["up_gamma"] * inv2).reshape(1, outer_nc).astype(jnp.float32)

    # ---- finalize: BN2 apply + NCHW layout + concat([x_image, y_up2_2], dim=1)
    z2d = z.reshape(B, H * W, outer_nc)      # free reshape (phase layout is contiguous)
    x2d = x.reshape(B, Ci, H * W)            # free reshape (NCHW contiguous)
    out = pl.pallas_call(
        functools.partial(_finalize_kernel, n_skip=Ci),
        grid=(B,),
        in_specs=[
            pl.BlockSpec((1, H * W, outer_nc), lambda b: (b, 0, 0)),
            pl.BlockSpec((1, outer_nc), lambda b: (0, 0)),
            pl.BlockSpec((1, outer_nc), lambda b: (0, 0)),
            pl.BlockSpec((1, Ci, H * W), lambda b: (b, 0, 0)),
        ],
        out_specs=pl.BlockSpec((1, Ci + outer_nc, H * W), lambda b: (b, 0, 0)),
        out_shape=jax.ShapeDtypeStruct((B, Ci + outer_nc, H * W), jnp.float32),
        compiler_params=pltpu.CompilerParams(dimension_semantics=("parallel",)),
    )(z2d, s2, t2, x2d)

    return y_ori_light, out.reshape(B, Ci + outer_nc, H, W)


if __name__ == "__main__":
    B, H, W = 2, 16, 16
    outer_nc, inner_nc = 4, 8
    input_nc = outer_nc                                    # input_nc defaults to outer_nc

    key = jax.random.PRNGKey(0)
    kp, kx, kl = jax.random.split(key, 3)
    params = init_params(kp, input_nc, inner_nc, outer_nc)
    x_image = jax.random.normal(kx, (B, input_nc, H, W), jnp.float32)   # NCHW like PyTorch
    x_new_light = jax.random.normal(kl, (B, inner_nc), jnp.float32)

    fwd = jax.jit(functools.partial(unet_block_forward, inner_nc=inner_nc, outer_nc=outer_nc))
    y_ori_light, y_out = fwd(params, x_image, x_new_light)
    y_ori_light, y_out = jax.block_until_ready((y_ori_light, y_out))

    assert y_out.shape == (B, input_nc + outer_nc, H, W)
    assert y_ori_light.shape == (B, inner_nc)
    assert bool(jnp.all(jnp.isfinite(y_out)))
    print("KERNEL_OK")
</pallas_src>

<mosaic_0001>
module attributes {stable_mosaic.version = 11 : i64} {
  func.func @_down_conv_kernel(%arg0: i32, %arg1: memref<1x9x9x16xf32, #tpu.memory_space<vmem>>, %arg2: memref<64x8xbf16, #tpu.memory_space<vmem>>, %arg3: memref<1x8x8x8xf32, #tpu.memory_space<vmem>>, %arg4: memref<1x2x8xf32, #tpu.memory_space<vmem>>) attributes {dimension_semantics = [#tpu.dimension_semantics<parallel>], iteration_bounds = array<i64: 2>, scalar_prefetch = 0 : i64, scratch_operands = 0 : i64, tpu.core_type = #tpu.core_type<tc>, window_params = [{transform_indices = @transform_0, window_bounds = array<i64: 1, 9, 9, 16>}, {pipeline_mode = #tpu.pipeline_mode<synchronous>, transform_indices = @transform_1, window_bounds = array<i64: 64, 8>}, {transform_indices = @transform_2, window_bounds = array<i64: 1, 8, 8, 8>}, {transform_indices = @transform_3, window_bounds = array<i64: 1, 2, 8>}]} {
    %c0 = arith.constant 0 : index
    %c0_0 = arith.constant 0 : index
    %c0_1 = arith.constant 0 : index
    %c0_2 = arith.constant 0 : index
    %0 = vector.load %arg1[%c0, %c0_0, %c0_1, %c0_2] : memref<1x9x9x16xf32, #tpu.memory_space<vmem>>, vector<1x9x9x16xf32>
    %1 = vector.shape_cast %0 : vector<1x9x9x16xf32> to vector<9x9x16xf32>
    %cst = arith.constant 0.000000e+00 : f32
    %2 = vector.broadcast %cst : f32 to vector<9x9x16xf32>
    %3 = arith.cmpf ogt, %1, %2 : vector<9x9x16xf32>
    %cst_3 = arith.constant 2.000000e-01 : f32
    %4 = vector.broadcast %cst_3 : f32 to vector<9x9x16xf32>
    %5 = arith.mulf %4, %1 : vector<9x9x16xf32>
    %6 = arith.select %3, %1, %5 : vector<9x9x16xi1>, vector<9x9x16xf32>
    %7 = vector.extract_strided_slice %6 {offsets = [0, 0, 0], sizes = [8, 8, 16], strides = [1, 1, 1]} : vector<9x9x16xf32> to vector<8x8x16xf32>
    %8 = vector.extract_strided_slice %6 {offsets = [0, 1, 0], sizes = [8, 8, 16], strides = [1, 1, 1]} : vector<9x9x16xf32> to vector<8x8x16xf32>
    %9 = vector.extract_strided_slice %6 {offsets = [1, 0, 0], sizes = [8, 8, 16], strides = [1, 1, 1]} : vector<9x9x16xf32> to vector<8x8x16xf32>
    %10 = vector.extract_strided_slice %6 {offsets = [1, 1, 0], sizes = [8, 8, 16], strides = [1, 1, 1]} : vector<9x9x16xf32> to vector<8x8x16xf32>
    %11 = tpu.concatenate %7, %8, %9, %10 in 2 : vector<8x8x16xf32>, vector<8x8x16xf32>, vector<8x8x16xf32>, vector<8x8x16xf32> -> vector<8x8x64xf32>
    %12 = arith.truncf %11 : vector<8x8x64xf32> to vector<8x8x64xbf16>
    %13 = vector.shape_cast %12 : vector<8x8x64xbf16> to vector<64x64xbf16>
    %c0_4 = arith.constant 0 : index
    %c0_5 = arith.constant 0 : index
    %14 = vector.load %arg2[%c0_4, %c0_5] : memref<64x8xbf16, #tpu.memory_space<vmem>>, vector<64x8xbf16>
    %cst_6 = arith.constant dense<0.000000e+00> : vector<64x8xf32>
    %15 = tpu.matmul %13, %14, %cst_6 {dimension_numbers = #tpu.dot_dimension_numbers<[1], [0], [0], [1], [0, 0, 1, 1], [], []>} : vector<64x64xbf16>, vector<64x8xbf16>, vector<64x8xf32> -> vector<64x8xf32>
    %16 = vector.shape_cast %15 : vector<64x8xf32> to vector<8x8x8xf32>
    %c0_7 = arith.constant 0 : index
    %c0_8 = arith.constant 0 : index
    %c0_9 = arith.constant 0 : index
    %c0_10 = arith.constant 0 : index
    %17 = vector.load %arg3[%c0_7, %c0_8, %c0_9, %c0_10] : memref<1x8x8x8xf32, #tpu.memory_space<vmem>>, vector<1x8x8x8xf32>
    %18 = vector.shape_cast %17 : vector<1x8x8x8xf32> to vector<8x8x8xf32>
    %19 = vector.shape_cast %16 : vector<8x8x8xf32> to vector<1x8x8x8xf32>
    tpu.vector_store %arg3[%c0_7, %c0_8, %c0_9, %c0_10], %19 {strides = array<i32>} : memref<1x8x8x8xf32, #tpu.memory_space<vmem>>, vector<1x8x8x8xf32>,
    %cst_11 = arith.constant dense<0.000000e+00> : vector<8xf32>
    %20 = vector.multi_reduction <add>, %15, %cst_11 [0] : vector<64x8xf32> to vector<8xf32>
    %21 = vector.shape_cast %20 : vector<8xf32> to vector<1x8xf32>
    %22 = arith.mulf %15, %15 : vector<64x8xf32>
    %cst_12 = arith.constant dense<0.000000e+00> : vector<8xf32>
    %23 = vector.multi_reduction <add>, %22, %cst_12 [0] : vector<64x8xf32> to vector<8xf32>
    %24 = vector.shape_cast %23 : vector<8xf32> to vector<1x8xf32>
    %25 = tpu.concatenate %21, %24 in 0 : vector<1x8xf32>, vector<1x8xf32> -> vector<2x8xf32>
    %c0_13 = arith.constant 0 : index
    %c0_14 = arith.constant 0 : index
    %c0_15 = arith.constant 0 : index
    %26 = vector.load %arg4[%c0_13, %c0_14, %c0_15] : memref<1x2x8xf32, #tpu.memory_space<vmem>>, vector<1x2x8xf32>
    %27 = vector.shape_cast %26 : vector<1x2x8xf32> to vector<2x8xf32>
    %28 = vector.shape_cast %25 : vector<2x8xf32> to vector<1x2x8xf32>
    tpu.vector_store %arg4[%c0_13, %c0_14, %c0_15], %28 {strides = array<i32>} : memref<1x2x8xf32, #tpu.memory_space<vmem>>, vector<1x2x8xf32>,
    return
  }
  func.func @transform_0(%arg0: i32) -> (i32, i32, i32, i32) {
    %c0_i32 = arith.constant 0 : i32
    %c0_i32_0 = arith.constant 0 : i32
    %c0_i32_1 = arith.constant 0 : i32
    %c0_i32_2 = arith.constant 0 : i32
    return %arg0, %c0_i32, %c0_i32_0, %c0_i32_1 : i32, i32, i32, i32
  }
  func.func @transform_1(%arg0: i32) -> (i32, i32) {
    %c0_i32 = arith.constant 0 : i32
    %c0_i32_0 = arith.constant 0 : i32
    %c0_i32_1 = arith.constant 0 : i32
    return %c0_i32, %c0_i32_0 : i32, i32
  }
  func.func @transform_2(%arg0: i32) -> (i32, i32, i32, i32) {
    %c0_i32 = arith.constant 0 : i32
    %c0_i32_0 = arith.constant 0 : i32
    %c0_i32_1 = arith.constant 0 : i32
    %c0_i32_2 = arith.constant 0 : i32
    return %arg0, %c0_i32, %c0_i32_0, %c0_i32_1 : i32, i32, i32, i32
  }
  func.func @transform_3(%arg0: i32) -> (i32, i32, i32) {
    %c0_i32 = arith.constant 0 : i32
    %c0_i32_0 = arith.constant 0 : i32
    %c0_i32_1 = arith.constant 0 : i32
    return %arg0, %c0_i32, %c0_i32_0 : i32, i32, i32
  }
}

module attributes {stable_mosaic.version = 11 : i64} {
  func.func @_up_convT_kernel(%arg0: i32, %arg1: memref<1x8x8x8xf32, #tpu.memory_space<vmem>>, %arg2: memref<1x8xf32, #tpu.memory_space<vmem>>, %arg3: memref<1x8xf32, #tpu.memory_space<vmem>>, %arg4: memref<1x1x8xf32, #tpu.memory_space<vmem>>, %arg5: memref<4x32x4xbf16, #tpu.memory_space<vmem>>, %arg6: memref<1x8x2x8x8xf32, #tpu.memory_space<vmem>>, %arg7: memref<1x2x4xf32, #tpu.memory_space<vmem>>, %arg8: memref<10x10x8xf32, #tpu.memory_space<vmem>>) attributes {dimension_semantics = [#tpu.dimension_semantics<parallel>], iteration_bounds = array<i64: 2>, scalar_prefetch = 0 : i64, scratch_operands = 1 : i64, tpu.core_type = #tpu.core_type<tc>, window_params = [{transform_indices = @transform_0, window_bounds = array<i64: 1, 8, 8, 8>}, {pipeline_mode = #tpu.pipeline_mode<synchronous>, transform_indices = @transform_1, window_bounds = array<i64: 1, 8>}, {pipeline_mode = #tpu.pipeline_mode<synchronous>, transform_indices = @transform_2, window_bounds = array<i64: 1, 8>}, {transform_indices = @transform_3, window_bounds = array<i64: 1, 1, 8>}, {pipeline_mode = #tpu.pipeline_mode<synchronous>, transform_indices = @transform_4, window_bounds = array<i64: 4, 32, 4>}, {transform_indices = @transform_5, window_bounds = array<i64: 1, 8, 2, 8, 8>}, {transform_indices = @transform_6, window_bounds = array<i64: 1, 2, 4>}]} {
    %c0 = arith.constant 0 : index
    %c0_0 = arith.constant 0 : index
    %c0_1 = arith.constant 0 : index
    %c0_2 = arith.constant 0 : index
    %0 = vector.load %arg1[%c0, %c0_0, %c0_1, %c0_2] : memref<1x8x8x8xf32, #tpu.memory_space<vmem>>, vector<1x8x8x8xf32>
    %1 = vector.shape_cast %0 : vector<1x8x8x8xf32> to vector<8x8x8xf32>
    %c0_3 = arith.constant 0 : index
    %c0_4 = arith.constant 0 : index
    %2 = vector.load %arg2[%c0_3, %c0_4] : memref<1x8xf32, #tpu.memory_space<vmem>>, vector<1x8xf32>
    %3 = vector.shape_cast %2 : vector<1x8xf32> to vector<8xf32>
    %4 = vector.shape_cast %3 : vector<8xf32> to vector<1x1x8xf32>
    %5 = vector.broadcast %4 : vector<1x1x8xf32> to vector<8x8x8xf32>
    %6 = arith.mulf %1, %5 : vector<8x8x8xf32>
    %c0_5 = arith.constant 0 : index
    %c0_6 = arith.constant 0 : index
    %7 = vector.load %arg3[%c0_5, %c0_6] : memref<1x8xf32, #tpu.memory_space<vmem>>, vector<1x8xf32>
    %8 = vector.shape_cast %7 : vector<1x8xf32> to vector<8xf32>
    %9 = vector.shape_cast %8 : vector<8xf32> to vector<1x1x8xf32>
    %10 = vector.broadcast %9 : vector<1x1x8xf32> to vector<8x8x8xf32>
    %11 = arith.addf %6, %10 : vector<8x8x8xf32>
    %c0_7 = arith.constant 0 : index
    %c0_8 = arith.constant 0 : index
    %c0_9 = arith.constant 0 : index
    %12 = vector.load %arg4[%c0_7, %c0_8, %c0_9] : memref<1x1x8xf32, #tpu.memory_space<vmem>>, vector<1x1x8xf32>
    %13 = vector.shape_cast %12 : vector<1x1x8xf32> to vector<8xf32>
    %14 = vector.shape_cast %13 : vector<8xf32> to vector<1x1x8xf32>
    %15 = vector.broadcast %14 : vector<1x1x8xf32> to vector<8x8x8xf32>
    %16 = arith.addf %11, %15 : vector<8x8x8xf32>
    %cst = arith.constant 0.000000e+00 : f32
    %17 = vector.broadcast %cst : f32 to vector<8x8x8xf32>
    %18 = arith.maximumf %16, %17 : vector<8x8x8xf32>
    %cst_10 = arith.constant 0.000000e+00 : f32
    %19 = vector.broadcast %cst_10 : f32 to vector<10x10x8xf32>
    %c0_11 = arith.constant 0 : index
    %c0_12 = arith.constant 0 : index
    %c0_13 = arith.constant 0 : index
    %20 = vector.load %arg8[%c0_11, %c0_12, %c0_13] : memref<10x10x8xf32, #tpu.memory_space<vmem>>, vector<10x10x8xf32>
    tpu.vector_store %arg8[%c0_11, %c0_12, %c0_13], %19 {strides = array<i32>} : memref<10x10x8xf32, #tpu.memory_space<vmem>>, vector<10x10x8xf32>,
    %c1 = arith.constant 1 : index
    %c1_14 = arith.constant 1 : index
    %c0_15 = arith.constant 0 : index
    %21 = vector.load %arg8[%c1, %c1_14, %c0_15] : memref<10x10x8xf32, #tpu.memory_space<vmem>>, vector<8x8x8xf32>
    tpu.vector_store %arg8[%c1, %c1_14, %c0_15], %18 {strides = array<i32>} : memref<10x10x8xf32, #tpu.memory_space<vmem>>, vector<8x8x8xf32>,
    %cst_16 = arith.constant 0.000000e+00 : f32
    %22 = vector.broadcast %cst_16 : f32 to vector<1x4xf32>
    %cst_17 = arith.constant 0.000000e+00 : f32
    %23 = vector.broadcast %cst_17 : f32 to vector<1x4xf32>
    %c1_18 = arith.constant 1 : index
    %c1_19 = arith.constant 1 : index
    %c0_20 = arith.constant 0 : index
    %24 = vector.load %arg8[%c1_18, %c1_19, %c0_20] : memref<10x10x8xf32, #tpu.memory_space<vmem>>, vector<8x8x8xf32>
    %c1_21 = arith.constant 1 : index
    %c0_22 = arith.constant 0 : index
    %c0_23 = arith.constant 0 : index
    %25 = vector.load %arg8[%c1_21, %c0_22, %c0_23] : memref<10x10x8xf32, #tpu.memory_space<vmem>>, vector<8x8x8xf32>
    %c0_24 = arith.constant 0 : index
    %c1_25 = arith.constant 1 : index
    %c0_26 = arith.constant 0 : index
    %26 = vector.load %arg8[%c0_24, %c1_25, %c0_26] : memref<10x10x8xf32, #tpu.memory_space<vmem>>, vector<8x8x8xf32>
    %c0_27 = arith.constant 0 : index
    %c0_28 = arith.constant 0 : index
    %c0_29 = arith.constant 0 : index
    %27 = vector.load %arg8[%c0_27, %c0_28, %c0_29] : memref<10x10x8xf32, #tpu.memory_space<vmem>>, vector<8x8x8xf32>
    %28 = tpu.concatenate %24, %25, %26, %27 in 2 : vector<8x8x8xf32>, vector<8x8x8xf32>, vector<8x8x8xf32>, vector<8x8x8xf32> -> vector<8x8x32xf32>
    %29 = arith.truncf %28 : vector<8x8x32xf32> to vector<8x8x32xbf16>
    %30 = vector.shape_cast %29 : vector<8x8x32xbf16> to vector<64x32xbf16>
    %c0_30 = arith.constant 0 : index
    %c0_31 = arith.constant 0 : index
    %c0_32 = arith.constant 0 : index
    %31 = vector.load %arg5[%c0_30, %c0_31, %c0_32] : memref<4x32x4xbf16, #tpu.memory_space<vmem>>, vector<1x32x4xbf16>
    %32 = vector.shape_cast %31 : vector<1x32x4xbf16> to vector<32x4xbf16>
    %cst_33 = arith.constant dense<0.000000e+00> : vector<64x4xf32>
    %33 = tpu.matmul %30, %32, %cst_33 {dimension_numbers = #tpu.dot_dimension_numbers<[1], [0], [0], [1], [0, 0, 1, 1], [], []>} : vector<64x32xbf16>, vector<32x4xbf16>, vector<64x4xf32> -> vector<64x4xf32>
    %cst_34 = arith.constant dense<0.000000e+00> : vector<4xf32>
    %34 = vector.multi_reduction <add>, %33, %cst_34 [0] : vector<64x4xf32> to vector<4xf32>
    %35 = vector.shape_cast %34 : vector<4xf32> to vector<1x4xf32>
    %36 = arith.addf %22, %35 : vector<1x4xf32>
    %37 = arith.mulf %33, %33 : vector<64x4xf32>
    %cst_35 = arith.constant dense<0.000000e+00> : vector<4xf32>
    %38 = vector.multi_reduction <add>, %37, %cst_35 [0] : vector<64x4xf32> to vector<4xf32>
    %39 = vector.shape_cast %38 : vector<4xf32> to vector<1x4xf32>
    %40 = arith.addf %23, %39 : vector<1x4xf32>
    %41 = vector.shape_cast %33 : vector<64x4xf32> to vector<8x8x4xf32>
    %c1_36 = arith.constant 1 : index
    %c1_37 = arith.constant 1 : index
    %c0_38 = arith.constant 0 : index
    %42 = vector.load %arg8[%c1_36, %c1_37, %c0_38] : memref<10x10x8xf32, #tpu.memory_space<vmem>>, vector<8x8x8xf32>
    %c1_39 = arith.constant 1 : index
    %c2 = arith.constant 2 : index
    %c0_40 = arith.constant 0 : index
    %43 = vector.load %arg8[%c1_39, %c2, %c0_40] : memref<10x10x8xf32, #tpu.memory_space<vmem>>, vector<8x8x8xf32>
    %c0_41 = arith.constant 0 : index
    %c1_42 = arith.constant 1 : index
    %c0_43 = arith.constant 0 : index
    %44 = vector.load %arg8[%c0_41, %c1_42, %c0_43] : memref<10x10x8xf32, #tpu.memory_space<vmem>>, vector<8x8x8xf32>
    %c0_44 = arith.constant 0 : index
    %c2_45 = arith.constant 2 : index
    %c0_46 = arith.constant 0 : index
    %45 = vector.load %arg8[%c0_44, %c2_45, %c0_46] : memref<10x10x8xf32, #tpu.memory_space<vmem>>, vector<8x8x8xf32>
    %46 = tpu.concatenate %42, %43, %44, %45 in 2 : vector<8x8x8xf32>, vector<8x8x8xf32>, vector<8x8x8xf32>, vector<8x8x8xf32> -> vector<8x8x32xf32>
    %47 = arith.truncf %46 : vector<8x8x32xf32> to vector<8x8x32xbf16>
    %48 = vector.shape_cast %47 : vector<8x8x32xbf16> to vector<64x32xbf16>
    %c1_47 = arith.constant 1 : index
    %c0_48 = arith.constant 0 : index
    %c0_49 = arith.constant 0 : index
    %49 = vector.load %arg5[%c1_47, %c0_48, %c0_49] : memref<4x32x4xbf16, #tpu.memory_space<vmem>>, vector<1x32x4xbf16>
    %50 = vector.shape_cast %49 : vector<1x32x4xbf16> to vector<32x4xbf16>
    %cst_50 = arith.constant dense<0.000000e+00> : vector<64x4xf32>
    %51 = tpu.matmul %48, %50, %cst_50 {dimension_numbers = #tpu.dot_dimension_numbers<[1], [0], [0], [1], [0, 0, 1, 1], [], []>} : vector<64x32xbf16>, vector<32x4xbf16>, vector<64x4xf32> -> vector<64x4xf32>
    %cst_51 = arith.constant dense<0.000000e+00> : vector<4xf32>
    %52 = vector.multi_reduction <add>, %51, %cst_51 [0] : vector<64x4xf32> to vector<4xf32>
    %53 = vector.shape_cast %52 : vector<4xf32> to vector<1x4xf32>
    %54 = arith.addf %36, %53 : vector<1x4xf32>
    %55 = arith.mulf %51, %51 : vector<64x4xf32>
    %cst_52 = arith.constant dense<0.000000e+00> : vector<4xf32>
    %56 = vector.multi_reduction <add>, %55, %cst_52 [0] : vector<64x4xf32> to vector<4xf32>
    %57 = vector.shape_cast %56 : vector<4xf32> to vector<1x4xf32>
    %58 = arith.addf %40, %57 : vector<1x4xf32>
    %59 = vector.shape_cast %51 : vector<64x4xf32> to vector<8x8x4xf32>
    %60 = tpu.concatenate %41, %59 in 2 : vector<8x8x4xf32>, vector<8x8x4xf32> -> vector<8x8x8xf32>
    %c0_53 = arith.constant 0 : index
    %c0_54 = arith.constant 0 : index
    %c0_55 = arith.constant 0 : index
    %c0_56 = arith.constant 0 : index
    %c0_57 = arith.constant 0 : index
    %61 = vector.load %arg6[%c0_53, %c0_54, %c0_55, %c0_56, %c0_57] : memref<1x8x2x8x8xf32, #tpu.memory_space<vmem>>, vector<1x8x1x8x8xf32>
    %62 = vector.shape_cast %61 : vector<1x8x1x8x8xf32> to vector<8x8x8xf32>
    %63 = vector.shape_cast %60 : vector<8x8x8xf32> to vector<1x8x1x8x8xf32>
    tpu.vector_store %arg6[%c0_53, %c0_54, %c0_55, %c0_56, %c0_57], %63 {strides = array<i32>} : memref<1x8x2x8x8xf32, #tpu.memory_space<vmem>>, vector<1x8x1x8x8xf32>,
    %c1_58 = arith.constant 1 : index
    %c1_59 = arith.constant 1 : index
    %c0_60 = arith.constant 0 : index
    %64 = vector.load %arg8[%c1_58, %c1_59, %c0_60] : memref<10x10x8xf32, #tpu.memory_space<vmem>>, vector<8x8x8xf32>
    %c1_61 = arith.constant 1 : index
    %c0_62 = arith.constant 0 : index
    %c0_63 = arith.constant 0 : index
    %65 = vector.load %arg8[%c1_61, %c0_62, %c0_63] : memref<10x10x8xf32, #tpu.memory_space<vmem>>, vector<8x8x8xf32>
    %c2_64 = arith.constant 2 : index
    %c1_65 = arith.constant 1 : index
    %c0_66 = arith.constant 0 : index
    %66 = vector.load %arg8[%c2_64, %c1_65, %c0_66] : memref<10x10x8xf32, #tpu.memory_space<vmem>>, vector<8x8x8xf32>
    %c2_67 = arith.constant 2 : index
    %c0_68 = arith.constant 0 : index
    %c0_69 = arith.constant 0 : index
    %67 = vector.load %arg8[%c2_67, %c0_68, %c0_69] : memref<10x10x8xf32, #tpu.memory_space<vmem>>, vector<8x8x8xf32>
    %68 = tpu.concatenate %64, %65, %66, %67 in 2 : vector<8x8x8xf32>, vector<8x8x8xf32>, vector<8x8x8xf32>, vector<8x8x8xf32> -> vector<8x8x32xf32>
    %69 = arith.truncf %68 : vector<8x8x32xf32> to vector<8x8x32xbf16>
    %70 = vector.shape_cast %69 : vector<8x8x32xbf16> to vector<64x32xbf16>
    %c2_70 = arith.constant 2 : index
    %c0_71 = arith.constant 0 : index
    %c0_72 = arith.constant 0 : index
    %71 = vector.load %arg5[%c2_70, %c0_71, %c0_72] : memref<4x32x4xbf16, #tpu.memory_space<vmem>>, vector<1x32x4xbf16>
    %72 = vector.shape_cast %71 : vector<1x32x4xbf16> to vector<32x4xbf16>
    %cst_73 = arith.constant dense<0.000000e+00> : vector<64x4xf32>
    %73 = tpu.matmul %70, %72, %cst_73 {dimension_numbers = #tpu.dot_dimension_numbers<[1], [0], [0], [1], [0, 0, 1, 1], [], []>} : vector<64x32xbf16>, vector<32x4xbf16>, vector<64x4xf32> -> vector<64x4xf32>
    %cst_74 = arith.constant dense<0.000000e+00> : vector<4xf32>
    %74 = vector.multi_reduction <add>, %73, %cst_74 [0] : vector<64x4xf32> to vector<4xf32>
    %75 = vector.shape_cast %74 : vector<4xf32> to vector<1x4xf32>
    %76 = arith.addf %54, %75 : vector<1x4xf32>
    %77 = arith.mulf %73, %73 : vector<64x4xf32>
    %cst_75 = arith.constant dense<0.000000e+00> : vector<4xf32>
    %78 = vector.multi_reduction <add>, %77, %cst_75 [0] : vector<64x4xf32> to vector<4xf32>
    %79 = vector.shape_cast %78 : vector<4xf32> to vector<1x4xf32>
    %80 = arith.addf %58, %79 : vector<1x4xf32>
    %81 = vector.shape_cast %73 : vector<64x4xf32> to vector<8x8x4xf32>
    %c1_76 = arith.constant 1 : index
    %c1_77 = arith.constant 1 : index
    %c0_78 = arith.constant 0 : index
    %82 = vector.load %arg8[%c1_76, %c1_77, %c0_78] : memref<10x10x8xf32, #tpu.memory_space<vmem>>, vector<8x8x8xf32>
    %c1_79 = arith.constant 1 : index
    %c2_80 = arith.constant 2 : index
    %c0_81 = arith.constant 0 : index
    %83 = vector.load %arg8[%c1_79, %c2_80, %c0_81] : memref<10x10x8xf32, #tpu.memory_space<vmem>>, vector<8x8x8xf32>
    %c2_82 = arith.constant 2 : index
    %c1_83 = arith.constant 1 : index
    %c0_84 = arith.constant 0 : index
    %84 = vector.load %arg8[%c2_82, %c1_83, %c0_84] : memref<10x10x8xf32, #tpu.memory_space<vmem>>, vector<8x8x8xf32>
    %c2_85 = arith.constant 2 : index
    %c2_86 = arith.constant 2 : index
    %c0_87 = arith.constant 0 : index
    %85 = vector.load %arg8[%c2_85, %c2_86, %c0_87] : memref<10x10x8xf32, #tpu.memory_space<vmem>>, vector<8x8x8xf32>
    %86 = tpu.concatenate %82, %83, %84, %85 in 2 : vector<8x8x8xf32>, vector<8x8x8xf32>, vector<8x8x8xf32>, vector<8x8x8xf32> -> vector<8x8x32xf32>
    %87 = arith.truncf %86 : vector<8x8x32xf32> to vector<8x8x32xbf16>
    %88 = vector.shape_cast %87 : vector<8x8x32xbf16> to vector<64x32xbf16>
    %c3 = arith.constant 3 : index
    %c0_88 = arith.constant 0 : index
    %c0_89 = arith.constant 0 : index
    %89 = vector.load %arg5[%c3, %c0_88, %c0_89] : memref<4x32x4xbf16, #tpu.memory_space<vmem>>, vector<1x32x4xbf16>
    %90 = vector.shape_cast %89 : vector<1x32x4xbf16> to vector<32x4xbf16>
    %cst_90 = arith.constant dense<0.000000e+00> : vector<64x4xf32>
    %91 = tpu.matmul %88, %90, %cst_90 {dimension_numbers = #tpu.dot_dimension_numbers<[1], [0], [0], [1], [0, 0, 1, 1], [], []>} : vector<64x32xbf16>, vector<32x4xbf16>, vector<64x4xf32> -> vector<64x4xf32>
    %cst_91 = arith.constant dense<0.000000e+00> : vector<4xf32>
    %92 = vector.multi_reduction <add>, %91, %cst_91 [0] : vector<64x4xf32> to vector<4xf32>
    %93 = vector.shape_cast %92 : vector<4xf32> to vector<1x4xf32>
    %94 = arith.addf %76, %93 : vector<1x4xf32>
    %95 = arith.mulf %91, %91 : vector<64x4xf32>
    %cst_92 = arith.constant dense<0.000000e+00> : vector<4xf32>
    %96 = vector.multi_reduction <add>, %95, %cst_92 [0] : vector<64x4xf32> to vector<4xf32>
    %97 = vector.shape_cast %96 : vector<4xf32> to vector<1x4xf32>
    %98 = arith.addf %80, %97 : vector<1x4xf32>
    %99 = vector.shape_cast %91 : vector<64x4xf32> to vector<8x8x4xf32>
    %100 = tpu.concatenate %81, %99 in 2 : vector<8x8x4xf32>, vector<8x8x4xf32> -> vector<8x8x8xf32>
    %c0_93 = arith.constant 0 : index
    %c0_94 = arith.constant 0 : index
    %c1_95 = arith.constant 1 : index
    %c0_96 = arith.constant 0 : index
    %c0_97 = arith.constant 0 : index
    %101 = vector.load %arg6[%c0_93, %c0_94, %c1_95, %c0_96, %c0_97] : memref<1x8x2x8x8xf32, #tpu.memory_space<vmem>>, vector<1x8x1x8x8xf32>
    %102 = vector.shape_cast %101 : vector<1x8x1x8x8xf32> to vector<8x8x8xf32>
    %103 = vector.shape_cast %100 : vector<8x8x8xf32> to vector<1x8x1x8x8xf32>
    tpu.vector_store %arg6[%c0_93, %c0_94, %c1_95, %c0_96, %c0_97], %103 {strides = array<i32>} : memref<1x8x2x8x8xf32, #tpu.memory_space<vmem>>, vector<1x8x1x8x8xf32>,
    %104 = tpu.concatenate %94, %98 in 0 : vector<1x4xf32>, vector<1x4xf32> -> vector<2x4xf32>
    %c0_98 = arith.constant 0 : index
    %c0_99 = arith.constant 0 : index
    %c0_100 = arith.constant 0 : index
    %105 = vector.load %arg7[%c0_98, %c0_99, %c0_100] : memref<1x2x4xf32, #tpu.memory_space<vmem>>, vector<1x2x4xf32>
    %106 = vector.shape_cast %105 : vector<1x2x4xf32> to vector<2x4xf32>
    %107 = vector.shape_cast %104 : vector<2x4xf32> to vector<1x2x4xf32>
    tpu.vector_store %arg7[%c0_98, %c0_99, %c0_100], %107 {strides = array<i32>} : memref<1x2x4xf32, #tpu.memory_space<vmem>>, vector<1x2x4xf32>,
    return
  }
  func.func @transform_0(%arg0: i32) -> (i32, i32, i32, i32) {
    %c0_i32 = arith.constant 0 : i32
    %c0_i32_0 = arith.constant 0 : i32
    %c0_i32_1 = arith.constant 0 : i32
    %c0_i32_2 = arith.constant 0 : i32
    return %arg0, %c0_i32, %c0_i32_0, %c0_i32_1 : i32, i32, i32, i32
  }
  func.func @transform_1(%arg0: i32) -> (i32, i32) {
    %c0_i32 = arith.constant 0 : i32
    %c0_i32_0 = arith.constant 0 : i32
    %c0_i32_1 = arith.constant 0 : i32
    return %c0_i32, %c0_i32_0 : i32, i32
  }
  func.func @transform_2(%arg0: i32) -> (i32, i32) {
    %c0_i32 = arith.constant 0 : i32
    %c0_i32_0 = arith.constant 0 : i32
    %c0_i32_1 = arith.constant 0 : i32
    return %c0_i32, %c0_i32_0 : i32, i32
  }
  func.func @transform_3(%arg0: i32) -> (i32, i32, i32) {
    %c0_i32 = arith.constant 0 : i32
    %c0_i32_0 = arith.constant 0 : i32
    %c0_i32_1 = arith.constant 0 : i32
    return %arg0, %c0_i32, %c0_i32_0 : i32, i32, i32
  }
  func.func @transform_4(%arg0: i32) -> (i32, i32, i32) {
    %c0_i32 = arith.constant 0 : i32
    %c0_i32_0 = arith.constant 0 : i32
    %c0_i32_1 = arith.constant 0 : i32
    %c0_i32_2 = arith.constant 0 : i32
    return %c0_i32, %c0_i32_0, %c0_i32_1 : i32, i32, i32
  }
  func.func @transform_5(%arg0: i32) -> (i32, i32, i32, i32, i32) {
    %c0_i32 = arith.constant 0 : i32
    %c0_i32_0 = arith.constant 0 : i32
    %c0_i32_1 = arith.constant 0 : i32
    %c0_i32_2 = arith.constant 0 : i32
    %c0_i32_3 = arith.constant 0 : i32
    return %arg0, %c0_i32, %c0_i32_0, %c0_i32_1, %c0_i32_2 : i32, i32, i32, i32, i32
  }
  func.func @transform_6(%arg0: i32) -> (i32, i32, i32) {
    %c0_i32 = arith.constant 0 : i32
    %c0_i32_0 = arith.constant 0 : i32
    %c0_i32_1 = arith.constant 0 : i32
    return %arg0, %c0_i32, %c0_i32_0 : i32, i32, i32
  }
}

module attributes {stable_mosaic.version = 11 : i64} {
  func.func @_finalize_kernel(%arg0: i32, %arg1: memref<1x256x4xf32, #tpu.memory_space<vmem>>, %arg2: memref<1x4xf32, #tpu.memory_space<vmem>>, %arg3: memref<1x4xf32, #tpu.memory_space<vmem>>, %arg4: memref<1x4x256xf32, #tpu.memory_space<vmem>>, %arg5: memref<1x8x256xf32, #tpu.memory_space<vmem>>) attributes {dimension_semantics = [#tpu.dimension_semantics<parallel>], iteration_bounds = array<i64: 2>, scalar_prefetch = 0 : i64, scratch_operands = 0 : i64, tpu.core_type = #tpu.core_type<tc>, window_params = [{transform_indices = @transform_0, window_bounds = array<i64: 1, 256, 4>}, {pipeline_mode = #tpu.pipeline_mode<synchronous>, transform_indices = @transform_1, window_bounds = array<i64: 1, 4>}, {pipeline_mode = #tpu.pipeline_mode<synchronous>, transform_indices = @transform_2, window_bounds = array<i64: 1, 4>}, {transform_indices = @transform_3, window_bounds = array<i64: 1, 4, 256>}, {transform_indices = @transform_4, window_bounds = array<i64: 1, 8, 256>}]} {
    %c0 = arith.constant 0 : index
    %c0_0 = arith.constant 0 : index
    %c0_1 = arith.constant 0 : index
    %0 = vector.load %arg1[%c0, %c0_0, %c0_1] : memref<1x256x4xf32, #tpu.memory_space<vmem>>, vector<1x256x4xf32>
    %1 = vector.shape_cast %0 : vector<1x256x4xf32> to vector<256x4xf32>
    %c0_2 = arith.constant 0 : index
    %c0_3 = arith.constant 0 : index
    %2 = vector.load %arg2[%c0_2, %c0_3] : memref<1x4xf32, #tpu.memory_space<vmem>>, vector<1x4xf32>
    %3 = vector.broadcast %2 : vector<1x4xf32> to vector<256x4xf32>
    %4 = arith.mulf %1, %3 : vector<256x4xf32>
    %c0_4 = arith.constant 0 : index
    %c0_5 = arith.constant 0 : index
    %5 = vector.load %arg3[%c0_4, %c0_5] : memref<1x4xf32, #tpu.memory_space<vmem>>, vector<1x4xf32>
    %6 = vector.broadcast %5 : vector<1x4xf32> to vector<256x4xf32>
    %7 = arith.addf %4, %6 : vector<256x4xf32>
    %c0_6 = arith.constant 0 : index
    %c0_7 = arith.constant 0 : index
    %c0_8 = arith.constant 0 : index
    %8 = vector.load %arg4[%c0_6, %c0_7, %c0_8] : memref<1x4x256xf32, #tpu.memory_space<vmem>>, vector<1x4x256xf32>
    %9 = vector.shape_cast %8 : vector<1x4x256xf32> to vector<4x256xf32>
    %c0_9 = arith.constant 0 : index
    %c0_10 = arith.constant 0 : index
    %c0_11 = arith.constant 0 : index
    %10 = vector.load %arg5[%c0_9, %c0_10, %c0_11] : memref<1x8x256xf32, #tpu.memory_space<vmem>>, vector<1x4x256xf32>
    %11 = vector.shape_cast %10 : vector<1x4x256xf32> to vector<4x256xf32>
    %12 = vector.shape_cast %9 : vector<4x256xf32> to vector<1x4x256xf32>
    tpu.vector_store %arg5[%c0_9, %c0_10, %c0_11], %12 {strides = array<i32>} : memref<1x8x256xf32, #tpu.memory_space<vmem>>, vector<1x4x256xf32>,
    %13 = tpu.transpose %7, [1, 0] : vector<256x4xf32> -> vector<4x256xf32>
    %c0_12 = arith.constant 0 : index
    %c4 = arith.constant 4 : index
    %c0_13 = arith.constant 0 : index
    %14 = vector.load %arg5[%c0_12, %c4, %c0_13] : memref<1x8x256xf32, #tpu.memory_space<vmem>>, vector<1x4x256xf32>
    %15 = vector.shape_cast %14 : vector<1x4x256xf32> to vector<4x256xf32>
    %16 = vector.shape_cast %13 : vector<4x256xf32> to vector<1x4x256xf32>
    tpu.vector_store %arg5[%c0_12, %c4, %c0_13], %16 {strides = array<i32>} : memref<1x8x256xf32, #tpu.memory_space<vmem>>, vector<1x4x256xf32>,
    return
  }
  func.func @transform_0(%arg0: i32) -> (i32, i32, i32) {
    %c0_i32 = arith.constant 0 : i32
    %c0_i32_0 = arith.constant 0 : i32
    %c0_i32_1 = arith.constant 0 : i32
    return %arg0, %c0_i32, %c0_i32_0 : i32, i32, i32
  }
  func.func @transform_1(%arg0: i32) -> (i32, i32) {
    %c0_i32 = arith.constant 0 : i32
    %c0_i32_0 = arith.constant 0 : i32
    %c0_i32_1 = arith.constant 0 : i32
    return %c0_i32, %c0_i32_0 : i32, i32
  }
  func.func @transform_2(%arg0: i32) -> (i32, i32) {
    %c0_i32 = arith.constant 0 : i32
    %c0_i32_0 = arith.constant 0 : i32
    %c0_i32_1 = arith.constant 0 : i32
    return %c0_i32, %c0_i32_0 : i32, i32
  }
  func.func @transform_3(%arg0: i32) -> (i32, i32, i32) {
    %c0_i32 = arith.constant 0 : i32
    %c0_i32_0 = arith.constant 0 : i32
    %c0_i32_1 = arith.constant 0 : i32
    return %arg0, %c0_i32, %c0_i32_0 : i32, i32, i32
  }
  func.func @transform_4(%arg0: i32) -> (i32, i32, i32) {
    %c0_i32 = arith.constant 0 : i32
    %c0_i32_0 = arith.constant 0 : i32
    %c0_i32_1 = arith.constant 0 : i32
    return %arg0, %c0_i32, %c0_i32_0 : i32, i32, i32
  }
}

</mosaic_0001>

<bundles_post_ra>
// kernel: unet_block_forward.3
= control target key start
LH: loop header
LB: loop body
LE: loop exit
PB: predicated region body
PF: predicated region fallthrough
CT: control target
= control target key end

     0   :  { %s802_s12 = smov 0   ;;  %s989_s0 = inlined_call_operand.vmem [shape: f32[2,9,9,16], index: 0, kind: input, shape index: {}]   ;;  %s990_s1 = inlined_call_operand.vmem [shape: bf16[64,8], index: 1, kind: input, shape index: {}]   ;;  %s991_s2 = inlined_call_operand.vmem [shape: f32[2,8,8,8], index: 2, kind: output, shape index: {0}]   ;;  %s992_s3 = inlined_call_operand.vmem [shape: f32[2,2,8], index: 3, kind: output, shape index: {1}]  }
   0x1 LB: > { %s651_s13 = sadd.s32 4294967295, %s777_s12   ;;  %p655_p0 = scmp.ge.s32.totalorder %s777_s12, 1  ;;  %s777_s12 = sphi %s802_s12, %s14_s12  }
   0x2   : > { %p140_p1 = scmp.lt.s32.totalorder %s777_s12, 3 }
   0x4   : > { %p141_p2 = pnand %p655_p0, %p140_p1 }
   0x5   : > { %p168_p3 = scmp.lt.s32.totalorder (!%p141_p2), %s651_s13, 1  ;;  %s779_s18 = smov (!%p141_p2), 32  }
   0x6   : > { %144 = sbr.rel (%p141_p2) target bundleno = 336 (0x150), region = 28  ;;  %s780_s19 = smov (!%p141_p2), 16  }
   0x7   : > { %s781_s20 = smov (!%p141_p2), 48  }
   0xb   : > { %s994_s13 = smov (!%p168_p3, %s651_s13), 1  ;;  %vm271_vm6 = vcmask 1046528  }
   0xc   : > { %s699_s14 = smul.u32 144, %s994_s13  ;;  %s682_s29 = sshll.u32 %s994_s13, 6 }
   0xd   : > { %s948_s5 = scalar_lea.vmem %s991_s2, %s682_s29  ;;  %s659_s6 = sshll.u32 %s994_s13, 1 }
   0xe   : > { %s816_s17 = scalar_lea.vmem %s989_s0, %s699_s14  ;;  %s181_s9 = scalar_lea.vmem %s992_s3, %s659_s6 }
   0xf   : > { %v185_v0 = vld [vmem:[%s816_s17 + $0x10] sm:$0xff]  ;;  %v187_v1 = vld [vmem:[%s816_s17 + $0x20] sm:$0xff]  ;;  %v194_v5 = vld [vmem:[%s816_s17 + $0x58] sm:$0x1] }
  0x10   : > { %v193_v2 = vld [vmem:[%s816_s17 + $0x50] sm:$0xff]  ;;  %vm203_vm0 = vcmp.gt.f32.partialorder %v185_v0, 0.0  ;;  %vm205_vm1 = vcmp.gt.f32.partialorder %v187_v1, 0.0  ;;  %v221_v3 = vmul.f32 0.2, %v185_v0  ;;  %v191_v8 = vld [vmem:[%s816_s17 + $0x40] sm:$0xff] }
  0x11   : > { %v223_v4 = vmul.f32 0.2, %v187_v1  ;;  %v192_v9 = vld [vmem:[%s816_s17 + $0x48] sm:$0x1]  ;;  %vm211_vm2 = vcmp.gt.f32.partialorder %v193_v2, 0.0  ;;  %vm212_vm3 = vcmp.gt.f32.partialorder %v194_v5, 0.0 }
  0x12   : > { %v822_v6 = vsel %vm203_vm0, %v185_v0, %v221_v3  ;;  %v195_v11 = vld [vmem:[%s816_s17 + $0x60] sm:$0xff]  ;;  %v229_v12 = vmul.f32 0.2, %v193_v2  ;;  %v230_v13 = vmul.f32 0.2, %v194_v5  ;;  %vm209_vm4 = vcmp.gt.f32.partialorder %v191_v8, 0.0 }
  0x13   : > { %v824_v7 = vsel %vm205_vm1, %v187_v1, %v223_v4  ;;  %v196_v14 = vld [vmem:[%s816_s17 + $0x68] sm:$0x1]  ;;  %vm210_vm5 = vcmp.gt.f32.partialorder %v192_v9, 0.0  ;;  %v227_v15 = vmul.f32 0.2, %v191_v8  ;;  %vm213_vm7 = vcmp.gt.f32.partialorder %v195_v11, 0.0 }
  0x14   : > { %v711_v10 = vpack.i.bf16 %v824_v7, %v822_v6  ;;  %v833_v16 = vsel %vm211_vm2, %v193_v2, %v229_v12  ;;  %v248_v17 = vsel %vm212_vm3, %v194_v5, %v230_v13  ;;  %v228_v18 = vmul.f32 0.2, %v192_v9  ;;  %v190_v25 = vld [vmem:[%s816_s17 + $0x38] sm:$0x1]  ;;  %v183_v26 = vld [vmem:[%s816_s17] sm:$0xff]  ;;  %v189_v36 = vld [vmem:[%s816_s17 + $0x30] sm:$0xff] }
  0x15   : > { %v231_v19 = vmul.f32 0.2, %v195_v11  ;;  %v287_v20 = vrot.slane %v833_v16, 1  ;;  %v288_v21 = vrot.slane %v248_v17, 1  ;;  %v232_v22 = vmul.f32 0.2, %v196_v14 }
  0x16   : > { %712 = vrot.lane.b32.xlu0 %v711_v10, %s779_s18  ;;  %v836_v23 = vsel %vm209_vm4, %v191_v8, %v227_v15  ;;  %v246_v24 = vsel %vm210_vm5, %v192_v9, %v228_v18  ;;  %v184_v30 = vld [vmem:[%s816_s17 + $0x8] sm:$0x1]  ;;  %v186_v31 = vld [vmem:[%s816_s17 + $0x18] sm:$0x1]  ;;  %v278_v32 = vrot.slane %v824_v7, 1  ;;  %v275_v33 = vrot.slane %v822_v6, 1 }
  0x17   : > { %v841_v27 = vsel %vm271_vm6, %v287_v20, %v288_v21  ;;  %v284_v28 = vrot.slane %v836_v23, 1  ;;  %v285_v29 = vrot.slane %v246_v24, 1  ;;  %vm214_vm8 = vcmp.gt.f32.partialorder %v196_v14, 0.0  ;;  %v188_v38 = vld [vmem:[%s816_s17 + $0x28] sm:$0x1]  ;;  %v197_v57 = vld [vmem:[%s816_s17 + $0x70] sm:$0xff] }
  0x18   : > { %v848_v34 = vsel %vm213_vm7, %v195_v11, %v231_v19  ;;  %v226_v37 = vmul.f32 0.2, %v190_v25  ;;  %vm201_vm9 = vcmp.gt.f32.partialorder %v183_v26, 0.0  ;;  %vm202_vm10 = vcmp.gt.f32.partialorder %v184_v30, 0.0  ;;  %v198_v58 = vld [vmem:[%s816_s17 + $0x78] sm:$0x1] }
  0x19   : > { %v851_v35 = vsel %vm271_vm6, %v284_v28, %v285_v29  ;;  %vm204_vm11 = vcmp.gt.f32.partialorder %v186_v31, 0.0  ;;  %v219_v40 = vmul.f32 0.2, %v183_v26  ;;  %v250_v41 = vsel %vm214_vm8, %v196_v14, %v232_v22  ;;  %v200_v11 = vld [vmem:[%s816_s17 + $0x88] sm:$0x1]  ;;  %v199_v12 = vld [vmem:[%s816_s17 + $0x80] sm:$0xff] }
  0x1a   : > { %v726_v39 = vpack.i.bf16 %v841_v27, %v851_v35  ;;  %vm208_vm12 = vcmp.gt.f32.partialorder %v190_v25, 0.0  ;;  %v220_v42 = vmul.f32 0.2, %v184_v30  ;;  %v222_v43 = vmul.f32 0.2, %v186_v31 }
  0x1b   : > { %v225_v44 = vmul.f32 0.2, %v189_v36  ;;  %v858_v45 = vsel %vm201_vm9, %v183_v26, %v219_v40  ;;  %vm206_vm13 = vcmp.gt.f32.partialorder %v188_v38, 0.0  ;;  %v224_v46 = vmul.f32 0.2, %v188_v38 }
  0x1c   : > { %727 = vrot.lane.b32.xlu1 %v726_v39, %s780_s19  ;;  %vm207_vm14 = vcmp.gt.f32.partialorder %v189_v36, 0.0  ;;  %v238_v47 = vsel %vm202_vm10, %v184_v30, %v220_v42  ;;  %v240_v48 = vsel %vm204_vm11, %v186_v31, %v222_v43  ;;  %v272_v49 = vrot.slane %v858_v45, 1 }
  0x1d   : > { %v244_v50 = vsel %vm208_vm12, %v190_v25, %v226_v37  ;;  %v273_v51 = vrot.slane %v238_v47, 1  ;;  %v276_v52 = vrot.slane %v240_v48, 1  ;;  %v242_v53 = vsel %vm206_vm13, %v188_v38, %v224_v46  ;;  %v683_v37 = vld [vmem:[%s990_s1] sm:$0xff] }
  0x1e   : > { %v290_v54 = vrot.slane %v848_v34, 1  ;;  %v291_v55 = vrot.slane %v250_v41, 1  ;;  %v279_v56 = vrot.slane %v242_v53, 1  ;;  %v864_v59 = vsel %vm207_vm14, %v189_v36, %v225_v44  ;;  %v684_v36 = vld [vmem:[%s990_s1 + $0x8] sm:$0xff] }
  0x1f   : > { %v274_v60 = vsel %vm271_vm6, %v272_v49, %v273_v51  ;;  %v277_v61 = vsel %vm271_vm6, %v275_v33, %v276_v52  ;;  %v716_v62 = vpack.i.bf16 %v848_v34, %v833_v16  ;;  %v281_v63 = vrot.slane %v864_v59, 1  ;;  %v686_v33 = vld [vmem:[%s990_s1 + $0x18] sm:$0xff] }
  0x20   : > { %v282_v0 = vrot.slane %v244_v50, 1  ;;  %v721_v1 = vpack.i.bf16 %v277_v61, %v274_v60  ;;  %v280_v2 = vsel %vm271_vm6, %v278_v32, %v279_v56  ;;  %v233_v4 = vmul.f32 0.2, %v197_v57  ;;  %477 = vmatpush.bf16.msra.mxu0 %v686_v33  ;;  %688 = vmatpush.bf16.msra.mxu2 %v686_v33 }
  0x21   : > { %v731_v3 = vpack.i.bf16 %v280_v2, %v277_v61  ;;  %717 = vrot.lane.b32.xlu2 %v716_v62, %s779_s18  ;;  %vm216_vm15 = vcmp.gt.f32.partialorder %v198_v58, 0.0  ;;  %vm215_vm0 = vcmp.gt.f32.partialorder %v197_v57, 0.0  ;;  %v234_v5 = vmul.f32 0.2, %v198_v58  ;;  %687 = vmatpush.bf16.msra.mxu1 %v686_v33 }
  0x22   : > { %722 = vrot.lane.b32.xlu0 %v721_v1, %s780_s19  ;;  %v292_v8 = vsel %vm271_vm6, %v290_v54, %v291_v55  ;;  %v283_v9 = vsel %vm271_vm6, %v281_v63, %v282_v0  ;;  %v879_v13 = vsel %vm215_vm0, %v197_v57, %v233_v4  ;;  %v746_v19 = vpack.i.bf16 %v836_v23, %v864_v59 }
  0x23   : > { %v252_v10 = vsel %vm216_vm15, %v198_v58, %v234_v5  ;;  %v736_v14 = vpack.i.bf16 %v283_v9, %v280_v2  ;;  %v741_v15 = vpack.i.bf16 %v292_v8, %v841_v27  ;;  %v293_v17 = vrot.slane %v879_v13, 1  ;;  %689 = vmatpush.bf16.msra.mxu3 %v686_v33 }
  0x24   : > { %732 = vrot.lane.b32.xlu1 %v731_v3, %s781_s20  ;;  %v294_v18 = vrot.slane %v252_v10, 1  ;;  %v236_v20 = vmul.f32 0.2, %v200_v11  ;;  %v235_v21 = vmul.f32 0.2, %v199_v12  ;;  %vm218_vm1 = vcmp.gt.f32.partialorder %v200_v11, 0.0 }
  0x25   : > { %vm217_vm2 = vcmp.gt.f32.partialorder %v199_v12, 0.0  ;;  %v756_v27 = vpack.i.bf16 %v851_v35, %v283_v9  ;;  %v685_v35 = vld [vmem:[%s990_s1 + $0x10] sm:$0xff]  ;;  %vm373_vm3 = vcmask 130048   ;;  %vm382_vm4 = vcmask 261120  }
  0x26   : > { %v295_v22 = vsel %vm271_vm6, %v293_v17, %v294_v18  ;;  %v254_v24 = vsel %vm218_vm1, %v200_v11, %v236_v20  ;;  %v253_v25 = vsel %vm217_vm2, %v199_v12, %v235_v21  ;;  %478 = vmatpush.bf16.msra.mxu0 %v685_v35  ;;  %691 = vmatpush.bf16.msra.mxu2 %v685_v35  ;;  %vm391_vm5 = vcmask 392192  }
  0x27   : > { %v751_v26 = vpack.i.bf16 %v295_v22, %v292_v8  ;;  %v346_v28 = vrot.slane %v253_v25, 1  ;;  %v347_v29 = vrot.slane %v254_v24, 1  ;;  %v761_v30 = vpack.i.bf16 %v253_v25, %v879_v13  ;;  %690 = vmatpush.bf16.msra.mxu1 %v685_v35  ;;  %692 = vmatpush.bf16.msra.mxu3 %v685_v35 }
  0x28   : > { %vm502_vm7 = vcmask 64512   ;;  %vm561_vm8 = vcmask 1040384   ;;  %vm563_vm9 = vcmask 58368  }
  0x29   : > { %737 = vrot.lane.b32.xlu2 %v736_v14, %s780_s19  ;;  %v348_v31 = vsel %vm271_vm6, %v346_v28, %v347_v29  ;;  %vm460_vm6 = vcmask 523264  }
  0x2a   : > { %742 = vrot.lane.b32.xlu0 %v741_v15, %s781_s20  ;;  %v766_v32 = vpack.i.bf16 %v348_v31, %v295_v22  ;;  %479 = vmatpush.bf16.msra.mxu0 %v684_v36 }
  0x2b   : > { %694 = vmatpush.bf16.msra.mxu2 %v684_v36  ;;  %693 = vmatpush.bf16.msra.mxu1 %v684_v36 }
  0x2c   : > { %747 = vrot.lane.b32.xlu1 %v746_v19, %s779_s18  ;;  %695 = vmatpush.bf16.msra.mxu3 %v684_v36 }
  0x2e   : > { %480 = vmatpush.bf16.msra.mxu0 %v683_v37 }
  0x2f   : > { %697 = vmatpush.bf16.msra.mxu2 %v683_v37  ;;  %696 = vmatpush.bf16.msra.mxu1 %v683_v37 }
  0x30   : > { %698 = vmatpush.bf16.msra.mxu3 %v683_v37 }
  0x31   : > { %752 = vrot.lane.b32.xlu2 %v751_v26, %s780_s19 }
  0x32   : > { %757 = vrot.lane.b32.xlu0 %v756_v27, %s781_s20 }
  0x34   : > { %762 = vrot.lane.b32.xlu1 %v761_v30, %s779_s18 }
  0x39   : > { %767 = vrot.lane.b32.xlu2 %v766_v32, %s781_s20 }
  0x7b   : > { %v718_v38 = vpop.permute.xlu2 %717 }
  0x7c   : > { %v720_v61 = vunpack.i.h.bf16 %v718_v38  ;;  %v719_v62 = vunpack.i.l.bf16 %v718_v38 }
  0x83   : > { %v738_v41 = vpop.permute.xlu2 %737 }
  0x84   : > { %v739_v15 = vunpack.i.l.bf16 %v738_v41 }
  0x86   : > { %v376_v27 = vsel %vm373_vm3, %v824_v7, %v739_v15 }
  0x88   : > { %v713_v39 = vpop.permute.xlu0 %712 }
  0x89   : > { %v715_v47 = vunpack.i.h.bf16 %v713_v39  ;;  %v714_v48 = vunpack.i.l.bf16 %v713_v39 }
  0x8b   : > { %v753_v57 = vpop.permute.xlu2 %752 }
  0x8c   : > { %v755_v24 = vunpack.i.h.bf16 %v753_v57  ;;  %v754_v25 = vunpack.i.l.bf16 %v753_v57 }
  0x8e   : > { %v728_v40 = vpop.permute.xlu1 %727  ;;  %v380_v7 = vsel %vm373_vm3, %v848_v34, %v754_v25 }
  0x8f   : > { %v730_v51 = vunpack.i.h.bf16 %v728_v40  ;;  %v729_v52 = vunpack.i.l.bf16 %v728_v40 }
  0x91   : > { %v379_v1 = vsel %vm373_vm3, %v833_v16, %v730_v51  ;;  %v740_v16 = vunpack.i.h.bf16 %v738_v41 }
  0x92   : > { %v388_v10 = vsel %vm382_vm4, %v379_v1, %v720_v61 }
  0x93   : > { %v768_v22 = vpop.permute.xlu2 %767  ;;  %v377_v26 = vsel %vm373_vm3, %v864_v59, %v740_v16  ;;  %v381_v59 = vsel %vm373_vm3, %v879_v13, %v755_v24 }
  0x94   : > { %v723_v42 = vpop.permute.xlu0 %722  ;;  %v770_v33 = vunpack.i.h.bf16 %v768_v22  ;;  %v769_v35 = vunpack.i.l.bf16 %v768_v22 }
  0x95   : > { %v725_v43 = vunpack.i.h.bf16 %v723_v42  ;;  %v724_v44 = vunpack.i.l.bf16 %v723_v42 }
  0x96   : > { %v733_v46 = vpop.permute.xlu1 %732 }
  0x97   : > { %v735_v49 = vunpack.i.h.bf16 %v733_v46  ;;  %v734_v50 = vunpack.i.l.bf16 %v733_v46  ;;  %v375_v53 = vsel %vm373_vm3, %v822_v6, %v725_v43  ;;  %v374_v54 = vsel %vm373_vm3, %v858_v45, %v724_v44 }
  0x98   : > { %v383_v55 = vsel %vm382_vm4, %v374_v54, %v714_v48  ;;  %v384_v56 = vsel %vm382_vm4, %v375_v53, %v715_v47  ;;  %v378_v6 = vsel %vm373_vm3, %v836_v23, %v729_v52 }
  0x99   : > { %v392_v58 = vsel %vm391_vm5, %v383_v55, %v734_v50  ;;  %v393_v60 = vsel %vm391_vm5, %v384_v56, %v735_v49  ;;  %v387_v9 = vsel %vm382_vm4, %v378_v6, %v719_v62 }
  0x9a   : > { %v400_v63 = vpack.c.bf16 %v392_v58, %v392_v58  ;;  %v401_v0 = vpack.c.bf16 %v393_v60, %v393_v60 }
  0x9c   : > { %v743_v45 = vpop.permute.xlu0 %742  ;;  %v424_v2 = vunpack.c.l.b16 %v400_v63  ;;  %v425_v3 = vunpack.c.l.b16 %v401_v0 }
  0x9d   : > { %v745_v4 = vunpack.i.h.bf16 %v743_v45  ;;  %v744_v5 = vunpack.i.l.bf16 %v743_v45 }
  0x9e   : > { %v748_v8 = vpop.permute.xlu1 %747  ;;  %v432_v11 = vpack.c.b16 %v425_v3, %v424_v2 }
  0x9f   : > { %v397_v12 = vsel %vm391_vm5, %v388_v10, %v745_v4  ;;  %v396_v14 = vsel %vm391_vm5, %v387_v9, %v744_v5  ;;  %v750_v18 = vunpack.i.h.bf16 %v748_v8  ;;  %v749_v19 = vunpack.i.l.bf16 %v748_v8 }
  0xa0   : > { %676 = vmatmul.msk.bf16.vlgmr.msra.gmra.mxu0 %vm460_vm6, %v432_v11  ;;  %v404_v23 = vpack.c.bf16 %v396_v14, %v396_v14  ;;  %v405_v17 = vpack.c.bf16 %v397_v12, %v397_v12 }
  0xa1   : > { %v386_v36 = vsel %vm382_vm4, %v377_v26, %v750_v18  ;;  %v385_v37 = vsel %vm382_vm4, %v376_v27, %v749_v19 }
  0xa2   : > { %v428_v20 = vunpack.c.l.b16 %v404_v23  ;;  %v429_v21 = vunpack.c.l.b16 %v405_v17 }
  0xa4   : > { %v758_v28 = vpop.permute.xlu0 %757  ;;  %v434_v29 = vpack.c.b16 %v429_v21, %v428_v20 }
  0xa5   : > { %v760_v30 = vunpack.i.h.bf16 %v758_v28  ;;  %v759_v31 = vunpack.i.l.bf16 %v758_v28 }
  0xa6   : > { %v763_v32 = vpop.permute.xlu1 %762  ;;  %678 = vmatmul.msk.bf16.vlgmr.msra.gmra.mxu2 %vm460_vm6, %v434_v29 }
  0xa7   : > { %v765_v38 = vunpack.i.h.bf16 %v763_v32  ;;  %v764_v39 = vunpack.i.l.bf16 %v763_v32  ;;  %v395_v40 = vsel %vm391_vm5, %v386_v36, %v760_v30  ;;  %v394_v41 = vsel %vm391_vm5, %v385_v37, %v759_v31 }
  0xa8   : > { %v403_v42 = vpack.c.bf16 %v395_v40, %v395_v40  ;;  %v402_v43 = vpack.c.bf16 %v394_v41, %v394_v41 }
  0xa9   : > { %v390_v44 = vsel %vm382_vm4, %v381_v59, %v765_v38  ;;  %v389_v46 = vsel %vm382_vm4, %v380_v7, %v764_v39 }
  0xaa   : > { %v398_v47 = vsel %vm391_vm5, %v389_v46, %v769_v35  ;;  %v399_v48 = vsel %vm391_vm5, %v390_v44, %v770_v33  ;;  %v427_v49 = vunpack.c.l.b16 %v403_v42  ;;  %v426_v13 = vunpack.c.l.b16 %v402_v43 }
  0xab   : > { %v406_v50 = vpack.c.bf16 %v398_v47, %v398_v47  ;;  %v407_v51 = vpack.c.bf16 %v399_v48, %v399_v48 }
  0xac   : > { %v433_v53 = vpack.c.b16 %v427_v49, %v426_v13 }
  0xad   : > { %v430_v34 = vunpack.c.l.b16 %v406_v50  ;;  %v431_v52 = vunpack.c.l.b16 %v407_v51 }
  0xae   : > { %677 = vmatmul.msk.bf16.vlgmr.msra.gmra.mxu1 %vm460_vm6, %v433_v53 }
  0xaf   : > { %v435_v54 = vpack.c.b16 %v431_v52, %v430_v34 }
  0xb1   : > { %679 = vmatmul.msk.bf16.vlgmr.msra.gmra.mxu3 %vm460_vm6, %v435_v54 }
 0x11d   : > { %v482_v55 = vpop.f32.mrf.mxu0 }
 0x11e   : > { %503 = vst.msk [vmem:[%s948_s5] sm:$0xff] %vm502_vm7, %v482_v55  ;;  %v532_v61 = vmul.f32 %v482_v55, %v482_v55  ;;  %v511_v0 = vsel %vm502_vm7, %v482_v55, 0.0 }
 0x120   : > { %v540_v3 = vsel %vm502_vm7, %v532_v61, 0.0 }
 0x125   : > { %v484_v56 = vpop.f32.mrf.mxu0 }
 0x126   : > { %504 = vst.msk [vmem:[%s948_s5 + $0x8] sm:$0xff] %vm502_vm7, %v484_v56  ;;  %v533_v60 = vmul.f32 %v484_v56, %v484_v56  ;;  %v512_v62 = vsel %vm502_vm7, %v484_v56, 0.0 }
 0x127   : > { %v513_v45 = vadd.f32 %v512_v62, %v511_v0 }
 0x128   : > { %v541_v1 = vsel %vm502_vm7, %v533_v60, 0.0 }
 0x129   : > { %v492_v57 = vpop.f32.mrf.mxu2  ;;  %v542_v5 = vadd.f32 %v541_v1, %v540_v3 }
 0x12a   : > { %507 = vst.msk [vmem:[%s948_s5 + $0x20] sm:$0xff] %vm502_vm7, %v492_v57  ;;  %v536_v11 = vmul.f32 %v492_v57, %v492_v57  ;;  %v518_v23 = vsel %vm502_vm7, %v492_v57, 0.0 }
 0x12b   : > { %v487_v58 = vpop.f32.mrf.mxu1 }
 0x12c   : > { %505 = vst.msk [vmem:[%s948_s5 + $0x10] sm:$0xff] %vm502_vm7, %v487_v58  ;;  %v534_v63 = vmul.f32 %v487_v58, %v487_v58  ;;  %v514_v6 = vsel %vm502_vm7, %v487_v58, 0.0  ;;  %v547_v21 = vsel %vm502_vm7, %v536_v11, 0.0 }
 0x12d   : > { %v515_v8 = vadd.f32 %v514_v6, %v513_v45 }
 0x12e   : > { %v543_v4 = vsel %vm502_vm7, %v534_v63, 0.0 }
 0x12f   : > { %v544_v16 = vadd.f32 %v543_v4, %v542_v5 }
 0x131   : > { %v494_v2 = vpop.f32.mrf.mxu2 }
 0x132   : > { %508 = vst.msk [vmem:[%s948_s5 + $0x28] sm:$0xff] %vm502_vm7, %v494_v2  ;;  %v537_v17 = vmul.f32 %v494_v2, %v494_v2  ;;  %v520_v22 = vsel %vm502_vm7, %v494_v2, 0.0 }
 0x133   : > { %v489_v9 = vpop.f32.mrf.mxu1 }
 0x134   : > { %v497_v10 = vpop.f32.mrf.mxu3  ;;  %506 = vst.msk [vmem:[%s948_s5 + $0x18] sm:$0xff] %vm502_vm7, %v489_v9  ;;  %v516_v12 = vsel %vm502_vm7, %v489_v9, 0.0  ;;  %v535_v14 = vmul.f32 %v489_v9, %v489_v9  ;;  %v549_v27 = vsel %vm502_vm7, %v537_v17, 0.0 }
 0x135   : > { %v517_v15 = vadd.f32 %v516_v12, %v515_v8  ;;  %509 = vst.msk [vmem:[%s948_s5 + $0x30] sm:$0xff] %vm502_vm7, %v497_v10  ;;  %v538_v24 = vmul.f32 %v497_v10, %v497_v10  ;;  %v522_v28 = vsel %vm502_vm7, %v497_v10, 0.0 }
 0x136   : > { %v545_v18 = vsel %vm502_vm7, %v535_v14, 0.0 }
 0x137   : > { %v519_v19 = vadd.f32 %v518_v23, %v517_v15  ;;  %v546_v20 = vadd.f32 %v545_v18, %v544_v16  ;;  %v551_v32 = vsel %vm502_vm7, %v538_v24, 0.0 }
 0x139   : > { %v548_v25 = vadd.f32 %v547_v21, %v546_v20  ;;  %v521_v26 = vadd.f32 %v520_v22, %v519_v19 }
 0x13b   : > { %v523_v29 = vadd.f32 %v522_v28, %v521_v26  ;;  %v550_v30 = vadd.f32 %v549_v27, %v548_v25 }
 0x13c   : > { %v499_v31 = vpop.f32.mrf.mxu3 }
 0x13d   : > { %510 = vst.msk [vmem:[%s948_s5 + $0x38] sm:$0xff] %vm502_vm7, %v499_v31  ;;  %v524_v33 = vsel %vm502_vm7, %v499_v31, 0.0  ;;  %v539_v35 = vmul.f32 %v499_v31, %v499_v31  ;;  %v552_v36 = vadd.f32 %v551_v32, %v550_v30 }
 0x13e   : > { %v525_v37 = vadd.f32 %v524_v33, %v523_v29 }
 0x13f   : > { %v553_v38 = vsel %vm502_vm7, %v539_v35, 0.0 }
 0x140   : > { %v526_v39 = vrot.slane %v525_v37, 4  ;;  %v554_v59 = vadd.f32 %v553_v38, %v552_v36 }
 0x142   : > { %v527_v7 = vadd.f32 %v526_v39, %v525_v37  ;;  %v555_v40 = vrot.slane %v554_v59, 4 }
 0x144   : > { %v528_v41 = vrot.slane %v527_v7, 2  ;;  %v556_v42 = vadd.f32 %v555_v40, %v554_v59 }
 0x146   : > { %v529_v43 = vadd.f32 %v528_v41, %v527_v7  ;;  %v557_v44 = vrot.slane %v556_v42, 2 }
 0x148   : > { %v530_v46 = vrot.slane %v529_v43, 1  ;;  %v558_v47 = vadd.f32 %v557_v44, %v556_v42 }
 0x14a   : > { %v559_v48 = vrot.slane %v558_v47, 1  ;;  %v531_v49 = vadd.f32 %v530_v46, %v529_v43 }
 0x14c   : > { %v560_v13 = vadd.f32 %v559_v48, %v558_v47 }
 0x14e   : > { %v562_v50 = vsel %vm561_vm8, %v531_v49, %v560_v13 }
 0x14f   : > { %564 = vst.msk [vmem:[%s181_s9] sm:$0x3] %vm563_vm9, %v562_v50 }
 0x150 PF: > { %s14_s12 = sadd.s32 1, %s777_s12  }
 0x151   : > { %p11_p4 = scmp.ge.s32.totalorder %s14_s12, 4  }
 0x153   :  { %13 = sbr.rel (!%p11_p4) target bundleno = 1 (0x1), region = 70 }

// kernel: unet_block_forward.5
= control target key start
LH: loop header
LB: loop body
LE: loop exit
PB: predicated region body
PF: predicated region fallthrough
CT: control target
= control target key end

     0   :  { %s529_s15 = smov 0   ;;  %s668_s0 = inlined_call_operand.vmem [shape: f32[2,256,4], index: 0, kind: input, shape index: {}]   ;;  %s669_s1 = inlined_call_operand.vmem [shape: f32[1,4], index: 1, kind: input, shape index: {}]   ;;  %s670_s2 = inlined_call_operand.vmem [shape: f32[1,4], index: 2, kind: input, shape index: {}]   ;;  %s671_s3 = inlined_call_operand.vmem [shape: f32[2,4,256], index: 3, kind: input, shape index: {}]   ;;  %s672_s4 = inlined_call_operand.vmem [shape: f32[2,8,256], index: 4, kind: output, shape index: {}]  }
   0x1 LB: > { %s470_s16 = sadd.s32 4294967295, %s502_s15   ;;  %p474_p0 = scmp.ge.s32.totalorder %s502_s15, 1  ;;  %s502_s15 = sphi %s529_s15, %s14_s15  }
   0x2   : > { %p172_p1 = scmp.lt.s32.totalorder %s502_s15, 3 }
   0x4   : > { %p173_p2 = pnand %p474_p0, %p172_p1 }
   0x5   : > { %p203_p3 = scmp.lt.s32.totalorder (!%p173_p2), %s470_s16, 1 }
   0x6   : > { %176 = sbr.rel (%p173_p2) target bundleno = 188 (0xbc), region = 36 }
   0xb   : > { %s674_s16 = smov (!%p203_p3, %s470_s16), 1  ;;  %v542_v0 = vld [vmem:[%s669_s1] ss:$0 sm:$0xff] }
   0xc   : > { %s483_s19 = sshll.u32 %s674_s16, 8  ;;  %v553_v1 = vld [vmem:[%s670_s2] ss:$0 sm:$0xff]  ;;  %s484_s25 = sshll.u32 %s674_s16, 3 }
   0xd   : > { %s548_s22 = scalar_lea.vmem %s668_s0, %s483_s19  ;;  %s212_s28 = scalar_lea.vmem %s671_s3, %s484_s25 }
   0xe   : > { %v234_v2 = vld [vmem:[%s548_s22 + $0x80] sm:$0xff]  ;;  %v235_v6 = vld [vmem:[%s548_s22 + $0x88] sm:$0xff]  ;;  %v236_v14 = vld [vmem:[%s548_s22 + $0x90] sm:$0xff]  ;;  %s485_s29 = sshll.u32 %s674_s16, 4 }
   0xf   : > { %v218_v3 = vld [vmem:[%s548_s22] sm:$0xff]  ;;  %v270_v4 = vmul.f32 %v542_v0, %v234_v2  ;;  %v219_v7 = vld [vmem:[%s548_s22 + $0x8] sm:$0xff]  ;;  %v271_v10 = vmul.f32 %v542_v0, %v235_v6  ;;  %v220_v15 = vld [vmem:[%s548_s22 + $0x10] sm:$0xff]  ;;  %v272_v16 = vmul.f32 %v542_v0, %v236_v14  ;;  %s643_s6 = scalar_lea.vmem %s672_s4, %s485_s29 }
  0x10   : > { %v254_v5 = vmul.f32 %v542_v0, %v218_v3  ;;  %v255_v11 = vmul.f32 %v542_v0, %v219_v7  ;;  %v256_v17 = vmul.f32 %v542_v0, %v220_v15  ;;  %v237_v20 = vld [vmem:[%s548_s22 + $0x98] sm:$0xff]  ;;  %v238_v26 = vld [vmem:[%s548_s22 + $0xa0] sm:$0xff]  ;;  %v239_v32 = vld [vmem:[%s548_s22 + $0xa8] sm:$0xff] }
  0x11   : > { %v306_v8 = vadd.f32 %v553_v1, %v270_v4  ;;  %v307_v12 = vadd.f32 %v553_v1, %v271_v10  ;;  %v308_v18 = vadd.f32 %v553_v1, %v272_v16  ;;  %v221_v21 = vld [vmem:[%s548_s22 + $0x18] sm:$0xff]  ;;  %v273_v22 = vmul.f32 %v542_v0, %v237_v20  ;;  %v222_v27 = vld [vmem:[%s548_s22 + $0x20] sm:$0xff]  ;;  %v223_v33 = vld [vmem:[%s548_s22 + $0x28] sm:$0xff] }
  0x12   : > { %v290_v9 = vadd.f32 %v553_v1, %v254_v5  ;;  %v291_v13 = vadd.f32 %v553_v1, %v255_v11  ;;  %v292_v19 = vadd.f32 %v553_v1, %v256_v17  ;;  %v257_v23 = vmul.f32 %v542_v0, %v221_v21  ;;  %v240_v38 = vld [vmem:[%s548_s22 + $0xb0] sm:$0xff]  ;;  %v241_v44 = vld [vmem:[%s548_s22 + $0xb8] sm:$0xff]  ;;  %v242_v50 = vld [vmem:[%s548_s22 + $0xc0] sm:$0xff] }
  0x13   : > { %363 = vxpose.xlu1.b32.start [1/16] (narrow) %v306_v8, 8  ;;  %v309_v24 = vadd.f32 %v553_v1, %v273_v22  ;;  %v274_v28 = vmul.f32 %v542_v0, %v238_v26  ;;  %v258_v29 = vmul.f32 %v542_v0, %v222_v27  ;;  %v275_v34 = vmul.f32 %v542_v0, %v239_v32  ;;  %v224_v39 = vld [vmem:[%s548_s22 + $0x30] sm:$0xff]  ;;  %v225_v45 = vld [vmem:[%s548_s22 + $0x38] sm:$0xff]  ;;  %v226_v51 = vld [vmem:[%s548_s22 + $0x40] sm:$0xff] }
  0x14   : > { %331 = vxpose.xlu0.b32.start [1/16] (narrow) %v290_v9, 8  ;;  %v293_v25 = vadd.f32 %v553_v1, %v257_v23  ;;  %v259_v35 = vmul.f32 %v542_v0, %v223_v33  ;;  %v276_v40 = vmul.f32 %v542_v0, %v240_v38  ;;  %v260_v41 = vmul.f32 %v542_v0, %v224_v39  ;;  %v243_v56 = vld [vmem:[%s548_s22 + $0xc8] sm:$0xff]  ;;  %v244_v62 = vld [vmem:[%s548_s22 + $0xd0] sm:$0xff]  ;;  %v245_v6 = vld [vmem:[%s548_s22 + $0xd8] sm:$0xff] }
  0x15   : > { %v310_v30 = vadd.f32 %v553_v1, %v274_v28  ;;  %v294_v31 = vadd.f32 %v553_v1, %v258_v29  ;;  %v311_v36 = vadd.f32 %v553_v1, %v275_v34  ;;  %v277_v46 = vmul.f32 %v542_v0, %v241_v44  ;;  %v227_v57 = vld [vmem:[%s548_s22 + $0x48] sm:$0xff]  ;;  %v228_v63 = vld [vmem:[%s548_s22 + $0x50] sm:$0xff]  ;;  %v229_v7 = vld [vmem:[%s548_s22 + $0x58] sm:$0xff] }
  0x16   : > { %v295_v37 = vadd.f32 %v553_v1, %v259_v35  ;;  %v312_v42 = vadd.f32 %v553_v1, %v276_v40  ;;  %v296_v43 = vadd.f32 %v553_v1, %v260_v41  ;;  %v261_v47 = vmul.f32 %v542_v0, %v225_v45  ;;  %v322_v16 = vld [vmem:[%s212_s28] sm:$0xff]  ;;  %v231_v20 = vld [vmem:[%s548_s22 + $0x68] sm:$0xff]  ;;  %v248_v27 = vld [vmem:[%s548_s22 + $0xf0] sm:$0xff] }
  0x17   : > { %v313_v48 = vadd.f32 %v553_v1, %v277_v46  ;;  %v278_v52 = vmul.f32 %v542_v0, %v242_v50  ;;  %v262_v53 = vmul.f32 %v542_v0, %v226_v51  ;;  %v279_v58 = vmul.f32 %v542_v0, %v243_v56  ;;  %324 = vst [vmem:[#allocation1] ss:$2 sm:$0xff] %v322_v16  ;;  %v232_v28 = vld [vmem:[%s548_s22 + $0x70] sm:$0xff]  ;;  %v249_v33 = vld [vmem:[%s548_s22 + $0xf8] sm:$0xff] }
  0x18   : > { %v297_v49 = vadd.f32 %v553_v1, %v261_v47  ;;  %v263_v59 = vmul.f32 %v542_v0, %v227_v57  ;;  %v280_v2 = vmul.f32 %v542_v0, %v244_v62  ;;  %v264_v3 = vmul.f32 %v542_v0, %v228_v63  ;;  %v233_v34 = vld [vmem:[%s548_s22 + $0x78] sm:$0xff] }
  0x19   : > { %v314_v54 = vadd.f32 %v553_v1, %v278_v52  ;;  %v298_v55 = vadd.f32 %v553_v1, %v262_v53  ;;  %v315_v60 = vadd.f32 %v553_v1, %v279_v58  ;;  %v281_v8 = vmul.f32 %v542_v0, %v245_v6 }
  0x1a   : > { %v299_v61 = vadd.f32 %v553_v1, %v263_v59  ;;  %v316_v4 = vadd.f32 %v553_v1, %v280_v2  ;;  %v300_v5 = vadd.f32 %v553_v1, %v264_v3  ;;  %v265_v9 = vmul.f32 %v542_v0, %v229_v7 }
  0x1b   : > { %364 = vxpose.xlu1.b32.cont [2/16] (narrow) %v307_v12, 8  ;;  %v317_v10 = vadd.f32 %v553_v1, %v281_v8  ;;  %v246_v12 = vld [vmem:[%s548_s22 + $0xe0] sm:$0xff]  ;;  %v267_v22 = vmul.f32 %v542_v0, %v231_v20  ;;  %v284_v29 = vmul.f32 %v542_v0, %v248_v27  ;;  %v285_v35 = vmul.f32 %v542_v0, %v249_v33 }
  0x1c   : > { %332 = vxpose.xlu0.b32.cont [2/16] (narrow) %v291_v13, 8  ;;  %v301_v11 = vadd.f32 %v553_v1, %v265_v9  ;;  %v230_v13 = vld [vmem:[%s548_s22 + $0x60] sm:$0xff]  ;;  %v282_v14 = vmul.f32 %v542_v0, %v246_v12 }
  0x1d   : > { %v266_v15 = vmul.f32 %v542_v0, %v230_v13  ;;  %v303_v26 = vadd.f32 %v553_v1, %v267_v22 }
  0x1e   : > { %v318_v17 = vadd.f32 %v553_v1, %v282_v14  ;;  %v325_v23 = vld.sshfl [vmem:[#allocation1] sm:$0xff pattern:$0x75316420] }
  0x1f   : > { %329 = vst [vmem:[%s643_s6] sm:$0xf] %v325_v23 }
  0x23   : > { %365 = vxpose.xlu1.b32.cont [3/16] (narrow) %v308_v18, 8  ;;  %v302_v18 = vadd.f32 %v553_v1, %v266_v15 }
  0x24   : > { %333 = vxpose.xlu0.b32.cont [3/16] (narrow) %v292_v19, 8  ;;  %v247_v19 = vld [vmem:[%s548_s22 + $0xe8] sm:$0xff] }
  0x25   : > { %v283_v21 = vmul.f32 %v542_v0, %v247_v19 }
  0x2b   : > { %366 = vxpose.xlu1.b32.cont [4/16] (narrow) %v309_v24, 8  ;;  %v326_v24 = vld.sshfl [vmem:[#allocation1 + $0x8] sm:$0xff pattern:$0x75316420] }
  0x2c   : > { %334 = vxpose.xlu0.b32.cont [4/16] (narrow) %v293_v25, 8  ;;  %330 = vst [vmem:[%s643_s6 + $0x8] sm:$0xf] %v326_v24  ;;  %v319_v25 = vadd.f32 %v553_v1, %v283_v21 }
  0x33   : > { %367 = vxpose.xlu1.b32.cont [5/16] (narrow) %v310_v30, 8  ;;  %v268_v30 = vmul.f32 %v542_v0, %v232_v28 }
  0x34   : > { %335 = vxpose.xlu0.b32.cont [5/16] (narrow) %v294_v31, 8  ;;  %v320_v31 = vadd.f32 %v553_v1, %v284_v29 }
  0x35   : > { %v304_v32 = vadd.f32 %v553_v1, %v268_v30 }
  0x3b   : > { %368 = vxpose.xlu1.b32.cont [6/16] (narrow) %v311_v36, 8  ;;  %v269_v36 = vmul.f32 %v542_v0, %v233_v34 }
  0x3c   : > { %336 = vxpose.xlu0.b32.cont [6/16] (narrow) %v295_v37, 8  ;;  %v321_v37 = vadd.f32 %v553_v1, %v285_v35 }
  0x3d   : > { %v305_v38 = vadd.f32 %v553_v1, %v269_v36 }
  0x43   : > { %369 = vxpose.xlu1.b32.cont [7/16] (narrow) %v312_v42, 8 }
  0x44   : > { %337 = vxpose.xlu0.b32.cont [7/16] (narrow) %v296_v43, 8 }
  0x4b   : > { %370 = vxpose.xlu1.b32.cont [8/16] (narrow) %v313_v48, 8 }
  0x4c   : > { %338 = vxpose.xlu0.b32.cont [8/16] (narrow) %v297_v49, 8 }
  0x53   : > { %371 = vxpose.xlu1.b32.cont [9/16] (narrow) %v314_v54, 8 }
  0x54   : > { %339 = vxpose.xlu0.b32.cont [9/16] (narrow) %v298_v55, 8 }
  0x5b   : > { %372 = vxpose.xlu1.b32.cont [10/16] (narrow) %v315_v60, 8 }
  0x5c   : > { %340 = vxpose.xlu0.b32.cont [10/16] (narrow) %v299_v61, 8 }
  0x63   : > { %373 = vxpose.xlu1.b32.cont [11/16] (narrow) %v316_v4, 8 }
  0x64   : > { %341 = vxpose.xlu0.b32.cont [11/16] (narrow) %v300_v5, 8 }
  0x6b   : > { %374 = vxpose.xlu1.b32.cont [12/16] (narrow) %v317_v10, 8 }
  0x6c   : > { %342 = vxpose.xlu0.b32.cont [12/16] (narrow) %v301_v11, 8 }
  0x73   : > { %375 = vxpose.xlu1.b32.cont [13/16] (narrow) %v318_v17, 8 }
  0x74   : > { %343 = vxpose.xlu0.b32.cont [13/16] (narrow) %v302_v18, 8 }
  0x7b   : > { %376 = vxpose.xlu1.b32.cont [14/16] (narrow) %v319_v25, 8 }
  0x7c   : > { %344 = vxpose.xlu0.b32.cont [14/16] (narrow) %v303_v26, 8 }
  0x83   : > { %377 = vxpose.xlu1.b32.cont [15/16] (narrow) %v320_v31, 8 }
  0x84   : > { %345 = vxpose.xlu0.b32.cont [15/16] (narrow) %v304_v32, 8 }
  0x8b   : > { %378 = vxpose.xlu1.b32.end [16/16] (narrow) %v321_v37, 8 }
  0x8c   : > { %346 = vxpose.xlu0.b32.end [16/16] (narrow) %v305_v38, 8 }
  0xb7   : > { %v379_v39 = vpop.trf.xlu1 }
  0xb8   : > { %v347_v40 = vpop.trf.xlu0  ;;  %v398_v41 = vrot.slane %v379_v39, 4 }
  0xb9   : > { %v397_v42 = vrot.slane %v347_v40, 4 }
  0xba   : > { %402 = vst [vmem:[%s643_s6 + $0x8] sm:$0xf0] %v398_v41 }
  0xbb   : > { %401 = vst [vmem:[%s643_s6] sm:$0xf0] %v397_v42 }
  0xbc PF: > { %s14_s15 = sadd.s32 1, %s502_s15  }
  0xbd   : > { %p11_p4 = scmp.ge.s32.totalorder %s14_s15, 4  }
  0xbf   :  { %13 = sbr.rel (!%p11_p4) target bundleno = 1 (0x1), region = 69 }

// kernel: unet_block_forward.4
= control target key start
LH: loop header
LB: loop body
LE: loop exit
PB: predicated region body
PF: predicated region fallthrough
CT: control target
= control target key end

     0   :  { %s1979_s21 = smov 0   ;;  %s2656_s0 = inlined_call_operand.vmem [shape: f32[2,8,8,8], index: 0, kind: input, shape index: {}]   ;;  %s2657_s1 = inlined_call_operand.vmem [shape: f32[1,8], index: 1, kind: input, shape index: {}]   ;;  %s2658_s2 = inlined_call_operand.vmem [shape: f32[1,8], index: 2, kind: input, shape index: {}]   ;;  %s2659_s3 = inlined_call_operand.vmem [shape: f32[2,1,8], index: 3, kind: input, shape index: {}]   ;;  %s2660_s4 = inlined_call_operand.vmem [shape: bf16[4,32,4], index: 4, kind: input, shape index: {}]   ;;  %s2661_s5 = inlined_call_operand.vmem [shape: f32[2,8,2,8,8], index: 5, kind: output, shape index: {0}]   ;;  %s2662_s6 = inlined_call_operand.vmem [shape: f32[2,2,4], index: 6, kind: output, shape index: {1}]  }
   0x1 LB: > { %s1625_s22 = sadd.s32 4294967295, %s1937_s21   ;;  %p1629_p0 = scmp.ge.s32.totalorder %s1937_s21, 1  ;;  %s1937_s21 = sphi %s1979_s21, %s17_s21  }
   0x2   : > { %p223_p1 = scmp.lt.s32.totalorder %s1937_s21, 3 }
   0x4   : > { %p224_p2 = pnand %p1629_p0, %p223_p1 }
   0x5   : > { %p260_p3 = scmp.lt.s32.totalorder (!%p224_p2), %s1625_s22, 1  ;;  %s1940_s10 = smov (!%p224_p2), 8  }
   0x6   : > { %227 = sbr.rel (%p224_p2) target bundleno = 502 (0x1f6), region = 40  ;;  %s1941_s11 = smov (!%p224_p2), 24  }
   0x7   : > { %s1942_s12 = smov (!%p224_p2), 16  }
   0xb   : > { %vm330_vm0 = vcmask 64512   ;;  %vm332_vm1 = vcmask 58368   ;;  %s2664_s22 = smov (!%p260_p3, %s1625_s22), 1  ;;  %v1939_v0 = vmov 0.0   ;;  %v1993_v1 = vld [vmem:[%s2657_s1] ss:$0 sm:$0xff] }
   0xc   : > { %334 = vst.msk [vmem:[#allocation2 + $0x10] sm:$0xff] %vm330_vm0, %v1939_v0  ;;  %s1705_s25 = sshll.u32 %s2664_s22, 6  ;;  %s267_s28 = scalar_lea.vmem %s2659_s3, %s2664_s22  ;;  %v2010_v2 = vld [vmem:[%s2658_s2] ss:$0 sm:$0xff]  ;;  %vm497_vm2 = vcmask 130048   ;;  %vm506_vm3 = vcmask 195584  }
   0xd   : > { %335 = vst.msk [vmem:[#allocation2 + $0x18] sm:$0x3] %vm332_vm1, %v1939_v0  ;;  %s2005_s7 = scalar_lea.vmem %s2656_s0, %s1705_s25  ;;  %v2019_v8 = vld [vmem:[%s267_s28] ss:$0 sm:$0xff]  ;;  %vm559_vm4 = vcmask 261120   ;;  %vm601_vm5 = vcmask 31744  }
   0xe   : > { %336 = vst.msk [vmem:[#allocation2 + $0x20] sm:$0xff] %vm330_vm0, %v1939_v0  ;;  %v278_v3 = vld [vmem:[%s2005_s7] sm:$0xff]  ;;  %v279_v4 = vld [vmem:[%s2005_s7 + $0x8] sm:$0xff]  ;;  %v280_v5 = vld [vmem:[%s2005_s7 + $0x10] sm:$0xff]  ;;  %s1706_s8 = sshll.u32 %s2664_s22, 7  ;;  %vm1526_vm6 = vcmask 1040384  }
   0xf   : > { %337 = vst.msk [vmem:[#allocation2 + $0x28] sm:$0x3] %vm332_vm1, %v1939_v0  ;;  %v290_v6 = vmul.f32 %v1993_v1, %v278_v3  ;;  %v291_v7 = vmul.f32 %v1993_v1, %v279_v4  ;;  %v281_v9 = vld [vmem:[%s2005_s7 + $0x18] sm:$0xff]  ;;  %v282_v10 = vld [vmem:[%s2005_s7 + $0x20] sm:$0xff]  ;;  %v292_v11 = vmul.f32 %v1993_v1, %v280_v5  ;;  %v283_v36 = vld [vmem:[%s2005_s7 + $0x28] sm:$0xff]  ;;  %vm1528_vm7 = vcmask 25600  }
  0x10   : > { %331 = vst.msk [vmem:[#allocation2] sm:$0xff] %vm330_vm0, %v1939_v0  ;;  %v293_v14 = vmul.f32 %v1993_v1, %v281_v9  ;;  %v294_v15 = vmul.f32 %v1993_v1, %v282_v10  ;;  %v284_v37 = vld [vmem:[%s2005_s7 + $0x30] sm:$0xff]  ;;  %v295_v41 = vmul.f32 %v1993_v1, %v283_v36  ;;  %v285_v3 = vld [vmem:[%s2005_s7 + $0x38] sm:$0xff]  ;;  %s1943_s7 = smov 4  }
  0x11   : > { %333 = vst.msk [vmem:[#allocation2 + $0x8] sm:$0x3] %vm332_vm1, %v1939_v0  ;;  %v302_v12 = vadd.f32 %v2010_v2, %v290_v6  ;;  %v303_v13 = vadd.f32 %v2010_v2, %v291_v7  ;;  %v304_v18 = vadd.f32 %v2010_v2, %v292_v11  ;;  %v296_v42 = vmul.f32 %v1993_v1, %v284_v37  ;;  %v1713_v36 = vld [vmem:[%s2660_s4 + $0x30] sm:$0xff]  ;;  %v1710_v37 = vld [vmem:[%s2660_s4 + $0x18] sm:$0xff] }
  0x12   : > { %338 = vst.msk [vmem:[#allocation2 + $0x30] sm:$0xff] %vm330_vm0, %v1939_v0  ;;  %v305_v21 = vadd.f32 %v2010_v2, %v293_v14  ;;  %v306_v22 = vadd.f32 %v2010_v2, %v294_v15  ;;  %v307_v47 = vadd.f32 %v2010_v2, %v295_v41  ;;  %v297_v5 = vmul.f32 %v1993_v1, %v285_v3 }
  0x13   : > { %339 = vst.msk [vmem:[#allocation2 + $0x38] sm:$0x3] %vm332_vm1, %v1939_v0  ;;  %v314_v16 = vadd.f32 %v2019_v8, %v302_v12  ;;  %v315_v17 = vadd.f32 %v2019_v8, %v303_v13  ;;  %v316_v23 = vadd.f32 %v2019_v8, %v304_v18  ;;  %v308_v48 = vadd.f32 %v2010_v2, %v296_v42 }
  0x14   : > { %340 = vst.msk [vmem:[#allocation2 + $0x40] sm:$0xff] %vm330_vm0, %v1939_v0  ;;  %v317_v24 = vadd.f32 %v2019_v8, %v305_v21  ;;  %v318_v25 = vadd.f32 %v2019_v8, %v306_v22  ;;  %v319_v50 = vadd.f32 %v2019_v8, %v307_v47  ;;  %v309_v6 = vadd.f32 %v2010_v2, %v297_v5  ;;  %v1711_v47 = vld [vmem:[%s2660_s4 + $0x20] sm:$0xff] }
  0x15   : > { %341 = vst.msk [vmem:[#allocation2 + $0x48] sm:$0x3] %vm332_vm1, %v1939_v0  ;;  %v322_v19 = vmax.f32 %v314_v16, 0.0  ;;  %v323_v20 = vmax.f32 %v315_v17, 0.0  ;;  %v324_v26 = vmax.f32 %v316_v23, 0.0  ;;  %v320_v51 = vadd.f32 %v2019_v8, %v308_v48  ;;  %821 = vmatpush.bf16.msra.mxu1 %v1710_v37  ;;  %v1707_v5 = vld [vmem:[%s2660_s4] sm:$0xff] }
  0x16   : > { %342 = vst.msk [vmem:[#allocation2 + $0x50] sm:$0xff] %vm330_vm0, %v1939_v0  ;;  %v325_v27 = vmax.f32 %v317_v24, 0.0  ;;  %v326_v30 = vmax.f32 %v318_v25, 0.0  ;;  %v327_v54 = vmax.f32 %v319_v50, 0.0  ;;  %v321_v7 = vadd.f32 %v2019_v8, %v309_v6 }
  0x17   : > { %343 = vst.msk [vmem:[#allocation2 + $0x58] sm:$0x3] %vm332_vm1, %v1939_v0  ;;  %v328_v55 = vmax.f32 %v320_v51, 0.0  ;;  %v385_v9 = vld [vmem:[#allocation2] sm:$0xff] }
  0x18   : > { %344 = vst.msk [vmem:[#allocation2 + $0x60] sm:$0xff] %vm330_vm0, %v1939_v0  ;;  %v662_v49 = vld [vmem:[#allocation2 + $0x2] sm:$0xff]  ;;  %v329_v10 = vmax.f32 %v321_v7, 0.0 }
  0x19   : > { %353 = vst.msk [vmem:[#allocation2 + $0x11] sm:$0xff] %vm330_vm0, %v322_v19  ;;  %v377_v52 = vld [vmem:[#allocation2 + $0x1] sm:$0xff] }
  0x1a   : > { %354 = vst.msk [vmem:[#allocation2 + $0x21] sm:$0xff] %vm330_vm0, %v323_v20 }
  0x1b   : > { %345 = vst.msk [vmem:[#allocation2 + $0x68] sm:$0x3] %vm332_vm1, %v1939_v0 }
  0x1c   : > { %346 = vst.msk [vmem:[#allocation2 + $0x70] sm:$0xff] %vm330_vm0, %v1939_v0 }
  0x1d   : > { %347 = vst.msk [vmem:[#allocation2 + $0x78] sm:$0x3] %vm332_vm1, %v1939_v0 }
  0x1e   : > { %348 = vst.msk [vmem:[#allocation2 + $0x80] sm:$0xff] %vm330_vm0, %v1939_v0 }
  0x1f   : > { %349 = vst.msk [vmem:[#allocation2 + $0x88] sm:$0x3] %vm332_vm1, %v1939_v0 }
  0x20   : > { %v1235_v28 = vld [vmem:[#allocation2 + $0x12] sm:$0xff]  ;;  %350 = vst.msk [vmem:[#allocation2 + $0x90] sm:$0xff] %vm330_vm0, %v1939_v0 }
  0x21   : > { %v2052_v29 = vld [vmem:[#allocation2 + $0x10] sm:$0xff]  ;;  %v1236_v31 = vld [vmem:[#allocation2 + $0x22] sm:$0xff]  ;;  %351 = vst.msk [vmem:[#allocation2 + $0x98] sm:$0x3] %vm332_vm1, %v1939_v0  ;;  %v1763_v56 = vpack.i.bf16 %v1235_v28, %v662_v49 }
  0x22   : > { %v370_v32 = vld [vmem:[#allocation2 + $0x20] sm:$0xff]  ;;  %v1738_v33 = vpack.i.bf16 %v1236_v31, %v1235_v28  ;;  %355 = vst.msk [vmem:[#allocation2 + $0x31] sm:$0xff] %vm330_vm0, %v324_v26  ;;  %v2078_v53 = vld [vmem:[#allocation2 + $0x11] sm:$0xff]  ;;  %v1803_v11 = vpack.i.bf16 %v2052_v29, %v385_v9 }
  0x23   : > { %v1728_v34 = vpack.i.bf16 %v370_v32, %v2052_v29  ;;  %356 = vst.msk [vmem:[#allocation2 + $0x41] sm:$0xff] %vm330_vm0, %v325_v27  ;;  %v2061_v35 = vld [vmem:[#allocation2 + $0x21] sm:$0xff]  ;;  %v1758_v57 = vpack.i.bf16 %v2078_v53, %v377_v52 }
  0x24   : > { %1739 = vrot.lane.b32.xlu1 %v1738_v33, %s1940_s10  ;;  %357 = vst.msk [vmem:[#allocation2 + $0x51] sm:$0xff] %vm330_vm0, %v326_v30 }
  0x25   : > { %1729 = vrot.lane.b32.xlu0 %v1728_v34, %s1940_s10  ;;  %358 = vst.msk [vmem:[#allocation2 + $0x61] sm:$0xff] %vm330_vm0, %v327_v54 }
  0x26   : > { %359 = vst.msk [vmem:[#allocation2 + $0x71] sm:$0xff] %vm330_vm0, %v328_v55 }
  0x27   : > { %360 = vst.msk [vmem:[#allocation2 + $0x81] sm:$0xff] %vm330_vm0, %v329_v10  ;;  %v976_v29 = vld [vmem:[#allocation2 + $0x90] sm:$0xff] }
  0x28   : > { %v968_v21 = vld [vmem:[#allocation2 + $0x91] sm:$0xff] }
  0x29   : > { %v1244_v38 = vld [vmem:[#allocation2 + $0x32] sm:$0xff] }
  0x2a   : > { %v2065_v39 = vld [vmem:[#allocation2 + $0x31] sm:$0xff]  ;;  %v1748_v43 = vpack.i.bf16 %v1244_v38, %v1236_v31  ;;  %v372_v45 = vld [vmem:[#allocation2 + $0x40] sm:$0xff] }
  0x2b   : > { %v371_v40 = vld [vmem:[#allocation2 + $0x30] sm:$0xff]  ;;  %v1743_v44 = vpack.i.bf16 %v2065_v39, %v2061_v35  ;;  %v1238_v58 = vld [vmem:[#allocation2 + $0x42] sm:$0xff] }
  0x2c   : > { %v1733_v46 = vpack.i.bf16 %v372_v45, %v371_v40  ;;  %1749 = vrot.lane.b32.xlu2 %v1748_v43, %s1941_s11  ;;  %v2086_v59 = vld [vmem:[#allocation2 + $0x41] sm:$0xff]  ;;  %v2088_v60 = vld [vmem:[#allocation2 + $0x51] sm:$0xff]  ;;  %v1768_v61 = vpack.i.bf16 %v1238_v58, %v1244_v38  ;;  %v1788_v4 = vpack.i.bf16 %v371_v40, %v370_v32 }
  0x2d   : > { %1744 = vrot.lane.b32.xlu1 %v1743_v44, %s1942_s12  ;;  %v1773_v62 = vpack.i.bf16 %v2088_v60, %v2086_v59  ;;  %v1246_v63 = vld [vmem:[#allocation2 + $0x52] sm:$0xff]  ;;  %v1240_v1 = vld [vmem:[#allocation2 + $0x62] sm:$0xff] }
  0x2e   : > { %1734 = vrot.lane.b32.xlu0 %v1733_v46, %s1940_s10  ;;  %v1783_v0 = vpack.i.bf16 %v1246_v63, %v1238_v58  ;;  %v2107_v2 = vld [vmem:[#allocation2 + $0x61] sm:$0xff]  ;;  %v2109_v12 = vld [vmem:[#allocation2 + $0x71] sm:$0xff]  ;;  %v1813_v13 = vpack.i.bf16 %v1240_v1, %v1246_v63 }
  0x2f   : > { %v1818_v8 = vpack.i.bf16 %v2109_v12, %v2107_v2  ;;  %v1248_v14 = vld [vmem:[#allocation2 + $0x72] sm:$0xff]  ;;  %v957_v18 = vld [vmem:[#allocation2 + $0x60] sm:$0xff] }
  0x30   : > { %v972_v15 = vld [vmem:[#allocation2 + $0x50] sm:$0xff]  ;;  %v1828_v16 = vpack.i.bf16 %v1248_v14, %v1240_v1  ;;  %v1242_v19 = vld [vmem:[#allocation2 + $0x82] sm:$0xff] }
  0x31   : > { %v1833_v17 = vpack.i.bf16 %v972_v15, %v372_v45  ;;  %v2122_v20 = vld [vmem:[#allocation2 + $0x81] sm:$0xff]  ;;  %v1868_v22 = vpack.i.bf16 %v957_v18, %v972_v15  ;;  %v1858_v23 = vpack.i.bf16 %v1242_v19, %v1248_v14  ;;  %v1250_v25 = vld [vmem:[#allocation2 + $0x92] sm:$0xff] }
  0x32   : > { %v1863_v24 = vpack.i.bf16 %v968_v21, %v2122_v20  ;;  %v974_v26 = vld [vmem:[#allocation2 + $0x70] sm:$0xff]  ;;  %v1873_v27 = vpack.i.bf16 %v1250_v25, %v1242_v19  ;;  %v959_v30 = vld [vmem:[#allocation2 + $0x80] sm:$0xff] }
  0x33   : > { %v1878_v28 = vpack.i.bf16 %v974_v26, %v957_v18  ;;  %v1913_v31 = vpack.i.bf16 %v976_v29, %v959_v30  ;;  %v1908_v32 = vpack.i.bf16 %v959_v30, %v974_v26  ;;  %v1709_v38 = vld [vmem:[%s2660_s4 + $0x10] sm:$0xff] }
  0x34   : > { %1754 = vrot.lane.b32.xlu2 %v1738_v33, %s1940_s10  ;;  %822 = vmatpush.bf16.msra.mxu1 %v1709_v38 }
  0x35   : > { %1764 = vrot.lane.b32.xlu1 %v1763_v56, %s1941_s11 }
  0x36   : > { %1759 = vrot.lane.b32.xlu0 %v1758_v57, %s1942_s12 }
  0x3c   : > { %1769 = vrot.lane.b32.xlu2 %v1768_v61, %s1940_s10 }
  0x3d   : > { %1779 = vrot.lane.b32.xlu1 %v1728_v34, %s1940_s10  ;;  %v1714_v34 = vld [vmem:[%s2660_s4 + $0x38] sm:$0xff] }
  0x3e   : > { %1774 = vrot.lane.b32.xlu0 %v1773_v62, %s1942_s12  ;;  %1402 = vmatpush.bf16.msra.mxu3 %v1714_v34 }
  0x42   : > { %1403 = vmatpush.bf16.msra.mxu3 %v1713_v36 }
  0x44   : > { %1784 = vrot.lane.b32.xlu2 %v1783_v0, %s1941_s11 }
  0x45   : > { %1794 = vrot.lane.b32.xlu1 %v1768_v61, %s1940_s10 }
  0x46   : > { %1789 = vrot.lane.b32.xlu0 %v1788_v4, %s1941_s11 }
  0x4c   : > { %1799 = vrot.lane.b32.xlu2 %v1743_v44, %s1942_s12 }
  0x4d   : > { %1809 = vrot.lane.b32.xlu1 %v1748_v43, %s1941_s11 }
  0x4e   : > { %1804 = vrot.lane.b32.xlu0 %v1803_v11, %s1941_s11 }
  0x54   : > { %1814 = vrot.lane.b32.xlu2 %v1813_v13, %s1940_s10 }
  0x55   : > { %1824 = vrot.lane.b32.xlu1 %v1733_v46, %s1940_s10  ;;  %v1712_v46 = vld [vmem:[%s2660_s4 + $0x28] sm:$0xff] }
  0x56   : > { %1819 = vrot.lane.b32.xlu0 %v1818_v8, %s1942_s12  ;;  %1160 = vmatpush.bf16.msra.mxu2 %v1712_v46 }
  0x5a   : > { %1161 = vmatpush.bf16.msra.mxu2 %v1711_v47 }
  0x5c   : > { %1829 = vrot.lane.b32.xlu2 %v1828_v16, %s1941_s11 }
  0x5d   : > { %1839 = vrot.lane.b32.xlu1 %v1813_v13, %s1940_s10 }
  0x5e   : > { %1834 = vrot.lane.b32.xlu0 %v1833_v17, %s1941_s11 }
  0x64   : > { %1844 = vrot.lane.b32.xlu2 %v1773_v62, %s1942_s12 }
  0x65   : > { %1854 = vrot.lane.b32.xlu1 %v1783_v0, %s1941_s11  ;;  %v1708_v0 = vld [vmem:[%s2660_s4 + $0x8] sm:$0xff] }
  0x66   : > { %1849 = vrot.lane.b32.xlu0 %v1788_v4, %s1941_s11  ;;  %578 = vmatpush.bf16.msra.mxu0 %v1708_v0 }
  0x6a   : > { %579 = vmatpush.bf16.msra.mxu0 %v1707_v5 }
  0x6c   : > { %1859 = vrot.lane.b32.xlu2 %v1858_v23, %s1940_s10 }
  0x6d   : > { %1869 = vrot.lane.b32.xlu1 %v1868_v22, %s1940_s10 }
  0x6e   : > { %1864 = vrot.lane.b32.xlu0 %v1863_v24, %s1942_s12 }
  0x74   : > { %1874 = vrot.lane.b32.xlu2 %v1873_v27, %s1941_s11 }
  0x75   : > { %1884 = vrot.lane.b32.xlu1 %v1868_v22, %s1940_s10 }
  0x76   : > { %1879 = vrot.lane.b32.xlu0 %v1878_v28, %s1941_s11 }
  0x7c   : > { %1889 = vrot.lane.b32.xlu2 %v1858_v23, %s1940_s10 }
  0x7d   : > { %1899 = vrot.lane.b32.xlu1 %v1833_v17, %s1941_s11 }
  0x7e   : > { %1894 = vrot.lane.b32.xlu0 %v1818_v8, %s1942_s12  ;;  %s1634_s12 = sshll.u32 %s2664_s22, 1 }
  0x7f   : > { %s276_s22 = scalar_lea.vmem %s2662_s6, %s1634_s12 }
  0x84   : > { %1904 = vrot.lane.b32.xlu2 %v1828_v16, %s1941_s11 }
  0x85   : > { %1914 = vrot.lane.b32.xlu1 %v1913_v31, %s1941_s11 }
  0x86   : > { %1909 = vrot.lane.b32.xlu0 %v1908_v32, %s1940_s10  ;;  %v1750_v33 = vpop.permute.xlu2 %1749 }
  0x87   : > { %v1752_v56 = vunpack.i.h.bf16 %v1750_v33  ;;  %v1751_v57 = vunpack.i.l.bf16 %v1750_v33 }
  0x8c   : > { %1919 = vrot.lane.b32.xlu2 %v1908_v32, %s1940_s10 }
  0x8e   : > { %1924 = vrot.lane.b32.xlu0 %v1878_v28, %s1941_s11  ;;  %v1755_v40 = vpop.permute.xlu2 %1754  ;;  %s2582_s11 = scalar_lea.vmem %s2661_s5, %s1706_s8 }
  0x8f   : > { %v1757_v6 = vunpack.i.h.bf16 %v1755_v40  ;;  %v1756_v7 = vunpack.i.l.bf16 %v1755_v40 }
  0x91   : > { %v735_v17 = vsel %vm330_vm0, %v2061_v35, %v1757_v6  ;;  %v734_v18 = vsel %vm330_vm0, %v2078_v53, %v1756_v7 }
  0x96   : > { %v2151_v41 = vpop.permute.xlu2 %1769  ;;  %v1740_v42 = vpop.permute.xlu1 %1739 }
  0x97   : > { %v2153_v43 = vpop.permute.xlu0 %1729  ;;  %v1742_v44 = vunpack.i.h.bf16 %v1740_v42  ;;  %v1741_v45 = vunpack.i.l.bf16 %v1740_v42  ;;  %v1772_v27 = vunpack.i.h.bf16 %v2151_v41  ;;  %v1771_v28 = vunpack.i.l.bf16 %v2151_v41 }
  0x99   : > { %v1316_v48 = vsel %vm330_vm0, %v2061_v35, %v1742_v44  ;;  %v1315_v49 = vsel %vm330_vm0, %v2078_v53, %v1741_v45  ;;  %v1318_v40 = vsel %vm330_vm0, %v2086_v59, %v1772_v27  ;;  %v1317_v42 = vsel %vm330_vm0, %v2065_v39, %v1771_v28 }
  0x9e   : > { %v1785_v51 = vpop.permute.xlu2 %1784 }
  0x9f   : > { %v2165_v50 = vpop.permute.xlu1 %1744  ;;  %v1787_v32 = vunpack.i.h.bf16 %v1785_v51  ;;  %v1786_v33 = vunpack.i.l.bf16 %v1785_v51 }
  0xa0   : > { %v1747_v52 = vunpack.i.h.bf16 %v2165_v50  ;;  %v1746_v54 = vunpack.i.l.bf16 %v2165_v50  ;;  %v2169_v55 = vpop.permute.xlu0 %1734 }
  0xa2   : > { %v1323_v58 = vsel %vm497_vm2, %v1315_v49, %v1746_v54  ;;  %v1324_v61 = vsel %vm497_vm2, %v1316_v48, %v1747_v52 }
  0xa3   : > { %v1331_v62 = vsel %vm506_vm3, %v1323_v58, %v1751_v57  ;;  %v1332_v63 = vsel %vm506_vm3, %v1324_v61, %v1752_v56 }
  0xa4   : > { %v1339_v3 = vpack.c.bf16 %v1331_v62, %v1331_v62  ;;  %v1340_v4 = vpack.c.bf16 %v1332_v63, %v1332_v63 }
  0xa6   : > { %v1360_v9 = vunpack.c.l.b16 %v1339_v3  ;;  %v1361_v10 = vunpack.c.l.b16 %v1340_v4  ;;  %v2193_v19 = vpop.permute.xlu2 %1799 }
  0xa7   : > { %v1765_v11 = vpop.permute.xlu1 %1764 }
  0xa8   : > { %v1767_v1 = vunpack.i.h.bf16 %v1765_v11  ;;  %v1766_v13 = vunpack.i.l.bf16 %v1765_v11  ;;  %v2185_v8 = vpop.permute.xlu0 %1759  ;;  %v1368_v16 = vpack.c.b16 %v1361_v10, %v1360_v9  ;;  %v1732_v11 = vunpack.i.h.bf16 %v2153_v43 }
  0xa9   : > { %v1762_v14 = vunpack.i.h.bf16 %v2185_v8  ;;  %v1761_v15 = vunpack.i.l.bf16 %v2185_v8 }
  0xaa   : > { %1691 = vmatmul.msk.bf16.vlgmr.msra.gmra.mxu3 %vm559_vm4, %v1368_v16  ;;  %v1731_v16 = vunpack.i.l.bf16 %v2153_v43 }
  0xab   : > { %v743_v21 = vsel %vm497_vm2, %v735_v17, %v1762_v14  ;;  %v742_v22 = vsel %vm497_vm2, %v734_v18, %v1761_v15 }
  0xac   : > { %v750_v23 = vsel %vm506_vm3, %v742_v22, %v1766_v13  ;;  %v751_v24 = vsel %vm506_vm3, %v743_v21, %v1767_v1  ;;  %v489_v43 = vsel %vm330_vm0, %v2078_v53, %v1731_v16 }
  0xad   : > { %v758_v25 = vpack.c.bf16 %v750_v23, %v750_v23  ;;  %v759_v26 = vpack.c.bf16 %v751_v24, %v751_v24  ;;  %v490_v23 = vsel %vm330_vm0, %v2061_v35, %v1732_v11  ;;  %v1802_v24 = vunpack.i.h.bf16 %v2193_v19 }
  0xae   : > { %v2214_v44 = vpop.permute.xlu2 %1814 }
  0xaf   : > { %v1780_v29 = vpop.permute.xlu1 %1779  ;;  %v779_v30 = vunpack.c.l.b16 %v758_v25  ;;  %v780_v31 = vunpack.c.l.b16 %v759_v26  ;;  %v1801_v25 = vunpack.i.l.bf16 %v2193_v19  ;;  %v1817_v8 = vunpack.i.h.bf16 %v2214_v44 }
  0xb0   : > { %v2206_v34 = vpop.permute.xlu0 %1774  ;;  %v1782_v41 = vunpack.i.h.bf16 %v1780_v29  ;;  %v1781_v45 = vunpack.i.l.bf16 %v1780_v29 }
  0xb1   : > { %v1777_v36 = vunpack.i.h.bf16 %v2206_v34  ;;  %v1776_v37 = vunpack.i.l.bf16 %v2206_v34  ;;  %v787_v38 = vpack.c.b16 %v780_v31, %v779_v30 }
  0xb2   : > { %v1074_v57 = vsel %vm330_vm0, %v2061_v35, %v1782_v41  ;;  %v1073_v58 = vsel %vm330_vm0, %v2078_v53, %v1781_v45  ;;  %v499_v53 = vsel %vm497_vm2, %v490_v23, %v1762_v14  ;;  %v1816_v14 = vunpack.i.l.bf16 %v2214_v44 }
  0xb3   : > { %v1326_v46 = vsel %vm497_vm2, %v1318_v40, %v1777_v36  ;;  %v1325_v47 = vsel %vm497_vm2, %v1317_v42, %v1776_v37  ;;  %1659 = vmatmul.msk.bf16.vlgmr.msra.gmra.mxu1 %vm559_vm4, %v787_v38  ;;  %v1081_v9 = vsel %vm497_vm2, %v1073_v58, %v1746_v54  ;;  %v1082_v10 = vsel %vm497_vm2, %v1074_v57, %v1747_v52 }
  0xb4   : > { %v1333_v48 = vsel %vm506_vm3, %v1325_v47, %v1786_v33  ;;  %v1334_v49 = vsel %vm506_vm3, %v1326_v46, %v1787_v32  ;;  %v498_v38 = vsel %vm497_vm2, %v489_v43, %v1761_v15  ;;  %v1320_v44 = vsel %vm330_vm0, %v2107_v2, %v1817_v8 }
  0xb5   : > { %v1341_v51 = vpack.c.bf16 %v1333_v48, %v1333_v48  ;;  %v1342_v56 = vpack.c.bf16 %v1334_v49, %v1334_v49 }
  0xb6   : > { %v1830_v17 = vpop.permute.xlu2 %1829 }
  0xb7   : > { %v1795_v61 = vpop.permute.xlu1 %1794  ;;  %v1362_v62 = vunpack.c.l.b16 %v1341_v51  ;;  %v1363_v63 = vunpack.c.l.b16 %v1342_v56 }
  0xb8   : > { %v1790_v0 = vpop.permute.xlu0 %1789  ;;  %v1797_v6 = vunpack.i.h.bf16 %v1795_v61  ;;  %v1796_v7 = vunpack.i.l.bf16 %v1795_v61 }
  0xb9   : > { %v1792_v3 = vunpack.i.h.bf16 %v1790_v0  ;;  %v1791_v4 = vunpack.i.l.bf16 %v1790_v0  ;;  %v1369_v5 = vpack.c.b16 %v1363_v63, %v1362_v62  ;;  %v1832_v63 = vunpack.i.h.bf16 %v1830_v17 }
  0xba   : > { %v737_v54 = vsel %vm330_vm0, %v2086_v59, %v1797_v6  ;;  %v736_v50 = vsel %vm330_vm0, %v2065_v39, %v1796_v7  ;;  %v1831_v0 = vunpack.i.l.bf16 %v1830_v17  ;;  %v1319_v7 = vsel %vm330_vm0, %v2088_v60, %v1816_v14 }
  0xbb   : > { %v1090_v1 = vsel %vm506_vm3, %v1082_v10, %v1792_v3  ;;  %v1089_v13 = vsel %vm506_vm3, %v1081_v9, %v1791_v4  ;;  %1692 = vmatmul.msk.bf16.gmra.mxu3 %vm559_vm4, %v1369_v5  ;;  %v744_v31 = vsel %vm497_vm2, %v736_v50, %v1801_v25  ;;  %v745_v35 = vsel %vm497_vm2, %v737_v54, %v1802_v24 }
  0xbc   : > { %v1097_v18 = vpack.c.bf16 %v1089_v13, %v1089_v13  ;;  %v1098_v21 = vpack.c.bf16 %v1090_v1, %v1090_v1 }
  0xbe   : > { %v1118_v52 = vunpack.c.l.b16 %v1097_v18  ;;  %v1119_v22 = vunpack.c.l.b16 %v1098_v21  ;;  %v2269_v56 = vpop.permute.xlu2 %1844 }
  0xbf   : > { %v1810_v26 = vpop.permute.xlu1 %1809 }
  0xc0   : > { %v1812_v27 = vunpack.i.h.bf16 %v1810_v26  ;;  %v1811_v28 = vunpack.i.l.bf16 %v1810_v26  ;;  %v1805_v29 = vpop.permute.xlu0 %1804  ;;  %v1126_v30 = vpack.c.b16 %v1119_v22, %v1118_v52 }
  0xc1   : > { %v1807_v32 = vunpack.i.h.bf16 %v1805_v29  ;;  %v1806_v33 = vunpack.i.l.bf16 %v1805_v29 }
  0xc2   : > { %v752_v40 = vsel %vm506_vm3, %v744_v31, %v1811_v28  ;;  %v753_v42 = vsel %vm506_vm3, %v745_v35, %v1812_v27  ;;  %1675 = vmatmul.msk.bf16.vlgmr.msra.gmra.mxu2 %vm559_vm4, %v1126_v30 }
  0xc3   : > { %v507_v41 = vsel %vm506_vm3, %v498_v38, %v1806_v33  ;;  %v508_v45 = vsel %vm506_vm3, %v499_v53, %v1807_v32  ;;  %v760_v46 = vpack.c.bf16 %v752_v40, %v752_v40  ;;  %v761_v47 = vpack.c.bf16 %v753_v42, %v753_v42 }
  0xc4   : > { %v515_v48 = vpack.c.bf16 %v507_v41, %v507_v41  ;;  %v516_v49 = vpack.c.bf16 %v508_v45, %v508_v45  ;;  %v1737_v32 = vunpack.i.h.bf16 %v2169_v55  ;;  %v1736_v33 = vunpack.i.l.bf16 %v2169_v55 }
  0xc5   : > { %v781_v51 = vunpack.c.l.b16 %v760_v46  ;;  %v782_v15 = vunpack.c.l.b16 %v761_v47  ;;  %v1847_v41 = vunpack.i.h.bf16 %v2269_v56 }
  0xc6   : > { %v535_v57 = vunpack.c.l.b16 %v515_v48  ;;  %v536_v58 = vunpack.c.l.b16 %v516_v49  ;;  %v1860_v23 = vpop.permute.xlu2 %1859  ;;  %v492_v46 = vsel %vm330_vm0, %v2086_v59, %v1737_v32  ;;  %v491_v47 = vsel %vm330_vm0, %v2065_v39, %v1736_v33 }
  0xc7   : > { %v1825_v61 = vpop.permute.xlu1 %1824  ;;  %v788_v62 = vpack.c.b16 %v782_v15, %v781_v51  ;;  %v1861_v19 = vunpack.i.l.bf16 %v1860_v23 }
  0xc8   : > { %v2271_v3 = vpop.permute.xlu0 %1819  ;;  %v543_v4 = vpack.c.b16 %v536_v58, %v535_v57  ;;  %v1827_v9 = vunpack.i.h.bf16 %v1825_v61  ;;  %v1826_v10 = vunpack.i.l.bf16 %v1825_v61 }
  0xc9   : > { %v1822_v5 = vunpack.i.h.bf16 %v2271_v3  ;;  %v1821_v6 = vunpack.i.l.bf16 %v2271_v3  ;;  %1660 = vmatmul.msk.bf16.gmra.mxu1 %vm559_vm4, %v788_v62 }
  0xca   : > { %1643 = vmatmul.msk.bf16.vlgmr.msra.gmra.mxu0 %vm559_vm4, %v543_v4  ;;  %v1076_v21 = vsel %vm330_vm0, %v2086_v59, %v1827_v9  ;;  %v1075_v54 = vsel %vm330_vm0, %v2065_v39, %v1826_v10  ;;  %v500_v59 = vsel %vm497_vm2, %v491_v47, %v1801_v25  ;;  %v501_v39 = vsel %vm497_vm2, %v492_v46, %v1802_v24 }
  0xcb   : > { %v1328_v11 = vsel %vm497_vm2, %v1320_v44, %v1822_v5  ;;  %v1327_v1 = vsel %vm497_vm2, %v1319_v7, %v1821_v6  ;;  %v1083_v31 = vsel %vm497_vm2, %v1075_v54, %v1776_v37  ;;  %v1084_v35 = vsel %vm497_vm2, %v1076_v21, %v1777_v36 }
  0xcc   : > { %v1335_v13 = vsel %vm506_vm3, %v1327_v1, %v1831_v0  ;;  %v1336_v16 = vsel %vm506_vm3, %v1328_v11, %v1832_v63  ;;  %v1846_v37 = vunpack.i.l.bf16 %v2269_v56  ;;  %v1862_v25 = vunpack.i.h.bf16 %v1860_v23 }
  0xcd   : > { %v1343_v17 = vpack.c.bf16 %v1335_v13, %v1335_v13  ;;  %v1344_v18 = vpack.c.bf16 %v1336_v16, %v1336_v16  ;;  %v1321_v23 = vsel %vm330_vm0, %v2109_v12, %v1861_v19 }
  0xce   : > { %v1875_v62 = vpop.permute.xlu2 %1874 }
  0xcf   : > { %v1840_v50 = vpop.permute.xlu1 %1839  ;;  %v1364_v52 = vunpack.c.l.b16 %v1343_v17  ;;  %v1365_v22 = vunpack.c.l.b16 %v1344_v18  ;;  %v1877_v18 = vunpack.i.h.bf16 %v1875_v62  ;;  %v1876_v21 = vunpack.i.l.bf16 %v1875_v62 }
  0xd0   : > { %v1835_v26 = vpop.permute.xlu0 %1834  ;;  %v1842_v29 = vunpack.i.h.bf16 %v1840_v50  ;;  %v1841_v30 = vunpack.i.l.bf16 %v1840_v50 }
  0xd1   : > { %v1837_v43 = vunpack.i.h.bf16 %v1835_v26  ;;  %v1836_v27 = vunpack.i.l.bf16 %v1835_v26  ;;  %v1370_v28 = vpack.c.b16 %v1365_v22, %v1364_v52 }
  0xd2   : > { %v739_v34 = vsel %vm330_vm0, %v2107_v2, %v1842_v29  ;;  %v738_v36 = vsel %vm330_vm0, %v2088_v60, %v1841_v30 }
  0xd3   : > { %v1091_v38 = vsel %vm506_vm3, %v1083_v31, %v1836_v27  ;;  %v1092_v53 = vsel %vm506_vm3, %v1084_v35, %v1837_v43  ;;  %1693 = vmatmul.msk.bf16.gmra.mxu3 %vm559_vm4, %v1370_v28  ;;  %v746_v14 = vsel %vm497_vm2, %v738_v36, %v1846_v37  ;;  %v747_v57 = vsel %vm497_vm2, %v739_v34, %v1847_v41 }
  0xd4   : > { %v1099_v40 = vpack.c.bf16 %v1091_v38, %v1091_v38  ;;  %v1100_v42 = vpack.c.bf16 %v1092_v53, %v1092_v53  ;;  %v1322_v43 = vsel %vm330_vm0, %v2122_v20, %v1862_v25 }
  0xd6   : > { %v1120_v45 = vunpack.c.l.b16 %v1099_v40  ;;  %v1121_v55 = vunpack.c.l.b16 %v1100_v42  ;;  %v1890_v31 = vpop.permute.xlu2 %1889 }
  0xd7   : > { %v1855_v48 = vpop.permute.xlu1 %1854 }
  0xd8   : > { %v1857_v49 = vunpack.i.h.bf16 %v1855_v48  ;;  %v1856_v51 = vunpack.i.l.bf16 %v1855_v48  ;;  %v1850_v15 = vpop.permute.xlu0 %1849  ;;  %v1127_v8 = vpack.c.b16 %v1121_v55, %v1120_v45 }
  0xd9   : > { %v1852_v58 = vunpack.i.h.bf16 %v1850_v15  ;;  %v1851_v61 = vunpack.i.l.bf16 %v1850_v15 }
  0xda   : > { %v754_v63 = vsel %vm506_vm3, %v746_v14, %v1856_v51  ;;  %v755_v0 = vsel %vm506_vm3, %v747_v57, %v1857_v49  ;;  %1676 = vmatmul.msk.bf16.gmra.mxu2 %vm559_vm4, %v1127_v8 }
  0xdb   : > { %v509_v4 = vsel %vm506_vm3, %v500_v59, %v1851_v61  ;;  %v510_v44 = vsel %vm506_vm3, %v501_v39, %v1852_v58  ;;  %v762_v7 = vpack.c.bf16 %v754_v63, %v754_v63  ;;  %v763_v11 = vpack.c.bf16 %v755_v0, %v755_v0 }
  0xdc   : > { %v517_v9 = vpack.c.bf16 %v509_v4, %v509_v4  ;;  %v518_v10 = vpack.c.bf16 %v510_v44, %v510_v44  ;;  %v1892_v61 = vunpack.i.h.bf16 %v1890_v31  ;;  %v1891_v59 = vunpack.i.l.bf16 %v1890_v31 }
  0xdd   : > { %v783_v1 = vunpack.c.l.b16 %v762_v7  ;;  %v784_v16 = vunpack.c.l.b16 %v763_v11 }
  0xde   : > { %v537_v13 = vunpack.c.l.b16 %v517_v9  ;;  %v538_v24 = vunpack.c.l.b16 %v518_v10  ;;  %v1905_v39 = vpop.permute.xlu2 %1904  ;;  %v740_v19 = vsel %vm330_vm0, %v2109_v12, %v1891_v59 }
  0xdf   : > { %v1870_v17 = vpop.permute.xlu1 %1869  ;;  %v789_v52 = vpack.c.b16 %v784_v16, %v783_v1  ;;  %v1906_v4 = vunpack.i.l.bf16 %v1905_v39 }
  0xe0   : > { %v2331_v54 = vpop.permute.xlu0 %1864  ;;  %v544_v50 = vpack.c.b16 %v538_v24, %v537_v13  ;;  %v1872_v27 = vunpack.i.h.bf16 %v1870_v17  ;;  %v1871_v28 = vunpack.i.l.bf16 %v1870_v17 }
  0xe1   : > { %v1867_v22 = vunpack.i.h.bf16 %v2331_v54  ;;  %v1866_v26 = vunpack.i.l.bf16 %v2331_v54  ;;  %1661 = vmatmul.msk.bf16.gmra.mxu1 %vm559_vm4, %v789_v52 }
  0xe2   : > { %1644 = vmatmul.msk.bf16.gmra.mxu0 %vm559_vm4, %v544_v50  ;;  %v1078_v53 = vsel %vm330_vm0, %v2107_v2, %v1872_v27  ;;  %v1077_v40 = vsel %vm330_vm0, %v2088_v60, %v1871_v28 }
  0xe3   : > { %v1330_v29 = vsel %vm497_vm2, %v1322_v43, %v1867_v22  ;;  %v1329_v30 = vsel %vm497_vm2, %v1321_v23, %v1866_v26  ;;  %v1085_v51 = vsel %vm497_vm2, %v1077_v40, %v1821_v6  ;;  %v1086_v15 = vsel %vm497_vm2, %v1078_v53, %v1822_v5 }
  0xe4   : > { %v1337_v35 = vsel %vm506_vm3, %v1329_v30, %v1876_v21  ;;  %v1338_v32 = vsel %vm506_vm3, %v1330_v29, %v1877_v18  ;;  %v1907_v5 = vunpack.i.h.bf16 %v1905_v39 }
  0xe5   : > { %v1345_v33 = vpack.c.bf16 %v1337_v35, %v1337_v35  ;;  %v1346_v38 = vpack.c.bf16 %v1338_v32, %v1338_v32 }
  0xe6   : > { %v1920_v29 = vpop.permute.xlu2 %1919 }
  0xe7   : > { %v1885_v42 = vpop.permute.xlu1 %1884  ;;  %v1366_v34 = vunpack.c.l.b16 %v1345_v33  ;;  %v1367_v36 = vunpack.c.l.b16 %v1346_v38  ;;  %v1922_v40 = vunpack.i.h.bf16 %v1920_v29 }
  0xe8   : > { %v1880_v45 = vpop.permute.xlu0 %1879  ;;  %v1887_v48 = vunpack.i.h.bf16 %v1885_v42  ;;  %v1886_v49 = vunpack.i.l.bf16 %v1885_v42  ;;  %v1921_v42 = vunpack.i.l.bf16 %v1920_v29 }
  0xe9   : > { %v1882_v55 = vunpack.i.h.bf16 %v1880_v45  ;;  %v1881_v46 = vunpack.i.l.bf16 %v1880_v45  ;;  %v1371_v47 = vpack.c.b16 %v1367_v36, %v1366_v34 }
  0xea   : > { %v494_v62 = vsel %vm330_vm0, %v2107_v2, %v1887_v48  ;;  %v493_v6 = vsel %vm330_vm0, %v2088_v60, %v1886_v49  ;;  %v741_v60 = vsel %vm330_vm0, %v2122_v20, %v1892_v61 }
  0xeb   : > { %v1093_v8 = vsel %vm506_vm3, %v1085_v51, %v1881_v46  ;;  %v1094_v14 = vsel %vm506_vm3, %v1086_v15, %v1882_v55  ;;  %1694 = vmatmul.msk.bf16.gmra.mxu3 %vm559_vm4, %v1371_v47  ;;  %v502_v11 = vsel %vm497_vm2, %v493_v6, %v1846_v37  ;;  %v503_v2 = vsel %vm497_vm2, %v494_v62, %v1847_v41 }
  0xec   : > { %v1101_v57 = vpack.c.bf16 %v1093_v8, %v1093_v8  ;;  %v1102_v58 = vpack.c.bf16 %v1094_v14, %v1094_v14  ;;  %v496_v51 = vsel %vm330_vm0, %v2122_v20, %v1922_v40  ;;  %v495_v15 = vsel %vm330_vm0, %v2109_v12, %v1921_v42 }
  0xee   : > { %v1122_v3 = vunpack.c.l.b16 %v1101_v57  ;;  %v1123_v63 = vunpack.c.l.b16 %v1102_v58 }
  0xef   : > { %v1900_v0 = vpop.permute.xlu1 %1899 }
  0xf0   : > { %v1902_v44 = vunpack.i.h.bf16 %v1900_v0  ;;  %v1901_v7 = vunpack.i.l.bf16 %v1900_v0  ;;  %v1895_v9 = vpop.permute.xlu0 %1894  ;;  %v1128_v10 = vpack.c.b16 %v1123_v63, %v1122_v3 }
  0xf1   : > { %v1897_v25 = vunpack.i.h.bf16 %v1895_v9  ;;  %v1896_v1 = vunpack.i.l.bf16 %v1895_v9 }
  0xf2   : > { %v511_v13 = vsel %vm506_vm3, %v502_v11, %v1901_v7  ;;  %v512_v24 = vsel %vm506_vm3, %v503_v2, %v1902_v44  ;;  %1677 = vmatmul.msk.bf16.gmra.mxu2 %vm559_vm4, %v1128_v10 }
  0xf3   : > { %v749_v37 = vsel %vm497_vm2, %v741_v60, %v1897_v25  ;;  %v748_v56 = vsel %vm497_vm2, %v740_v19, %v1896_v1  ;;  %v519_v16 = vpack.c.bf16 %v511_v13, %v511_v13  ;;  %v520_v41 = vpack.c.bf16 %v512_v24, %v512_v24 }
  0xf4   : > { %v756_v17 = vsel %vm506_vm3, %v748_v56, %v1906_v4  ;;  %v757_v18 = vsel %vm506_vm3, %v749_v37, %v1907_v5  ;;  %v505_v54 = vsel %vm497_vm2, %v496_v51, %v1897_v25 }
  0xf5   : > { %v764_v21 = vpack.c.bf16 %v756_v17, %v756_v17  ;;  %v765_v50 = vpack.c.bf16 %v757_v18, %v757_v18  ;;  %v539_v52 = vunpack.c.l.b16 %v519_v16  ;;  %v540_v43 = vunpack.c.l.b16 %v520_v41 }
  0xf7   : > { %v1915_v23 = vpop.permute.xlu1 %1914  ;;  %v785_v27 = vunpack.c.l.b16 %v764_v21  ;;  %v786_v28 = vunpack.c.l.b16 %v765_v50  ;;  %v545_v35 = vpack.c.b16 %v540_v43, %v539_v52 }
  0xf8   : > { %v1910_v30 = vpop.permute.xlu0 %1909  ;;  %v1917_v31 = vunpack.i.h.bf16 %v1915_v23  ;;  %v1916_v38 = vunpack.i.l.bf16 %v1915_v23 }
  0xf9   : > { %v1912_v32 = vunpack.i.h.bf16 %v1910_v30  ;;  %v1911_v33 = vunpack.i.l.bf16 %v1910_v30  ;;  %v790_v53 = vpack.c.b16 %v786_v28, %v785_v27  ;;  %1645 = vmatmul.msk.bf16.gmra.mxu0 %vm559_vm4, %v545_v35 }
  0xfb   : > { %v1080_v34 = vsel %vm330_vm0, %v2122_v20, %v1912_v32  ;;  %v1079_v36 = vsel %vm330_vm0, %v2109_v12, %v1911_v33  ;;  %1662 = vmatmul.msk.bf16.gmra.mxu1 %vm559_vm4, %v790_v53 }
  0xfc   : > { %v1087_v45 = vsel %vm497_vm2, %v1079_v36, %v1866_v26  ;;  %v1088_v55 = vsel %vm497_vm2, %v1080_v34, %v1867_v22  ;;  %v504_v22 = vsel %vm497_vm2, %v495_v15, %v1896_v1 }
  0xfd   : > { %v1095_v46 = vsel %vm506_vm3, %v1087_v45, %v1916_v38  ;;  %v1096_v47 = vsel %vm506_vm3, %v1088_v55, %v1917_v31 }
  0xfe   : > { %v1103_v48 = vpack.c.bf16 %v1095_v46, %v1095_v46  ;;  %v1104_v49 = vpack.c.bf16 %v1096_v47, %v1096_v47 }
 0x100   : > { %v1925_v8 = vpop.permute.xlu0 %1924  ;;  %v1124_v14 = vunpack.c.l.b16 %v1103_v48  ;;  %v1125_v57 = vunpack.c.l.b16 %v1104_v49 }
 0x101   : > { %v1927_v26 = vunpack.i.h.bf16 %v1925_v8  ;;  %v1926_v58 = vunpack.i.l.bf16 %v1925_v8 }
 0x102   : > { %v1129_v61 = vpack.c.b16 %v1125_v57, %v1124_v14 }
 0x103   : > { %v513_v59 = vsel %vm506_vm3, %v504_v22, %v1926_v58  ;;  %v514_v39 = vsel %vm506_vm3, %v505_v54, %v1927_v26 }
 0x104   : > { %1678 = vmatmul.msk.bf16.gmra.mxu2 %vm559_vm4, %v1129_v61  ;;  %v521_v20 = vpack.c.bf16 %v513_v59, %v513_v59  ;;  %v522_v62 = vpack.c.bf16 %v514_v39, %v514_v39 }
 0x106   : > { %v541_v6 = vunpack.c.l.b16 %v521_v20  ;;  %v542_v12 = vunpack.c.l.b16 %v522_v62 }
 0x108   : > { %v546_v3 = vpack.c.b16 %v542_v12, %v541_v6 }
 0x10a   : > { %1646 = vmatmul.msk.bf16.gmra.mxu0 %vm559_vm4, %v546_v3 }
 0x12d   : > { %v1405_v63 = vpop.f32.mrf.mxu3 }
 0x12e   : > { %1485 = vrot.lane.b32.xlu0 %v1405_v63, %s1943_s7  ;;  %v1447_v0 = vmul.f32 %v1405_v63, %v1405_v63  ;;  %v1425_v44 = vsel %vm601_vm5, %v1405_v63, 0.0 }
 0x130   : > { %v824_v5 = vpop.f32.mrf.mxu1  ;;  %v1455_v11 = vsel %vm601_vm5, %v1447_v0, 0.0 }
 0x131   : > { %904 = vrot.lane.b32.xlu1 %v824_v5, %s1943_s7  ;;  %v866_v7 = vmul.f32 %v824_v5, %v824_v5  ;;  %v844_v1 = vsel %vm601_vm5, %v824_v5, 0.0 }
 0x133   : > { %v874_v56 = vsel %vm601_vm5, %v866_v7, 0.0 }
 0x135   : > { %v1407_v4 = vpop.f32.mrf.mxu3 }
 0x136   : > { %v1426_v9 = vsel %vm601_vm5, %v1407_v4, 0.0  ;;  %v1448_v10 = vmul.f32 %v1407_v4, %v1407_v4 }
 0x137   : > { %v1427_v2 = vadd.f32 %v1426_v9, %v1425_v44 }
 0x138   : > { %v826_v25 = vpop.f32.mrf.mxu1  ;;  %v1456_v60 = vsel %vm601_vm5, %v1448_v10, 0.0 }
 0x139   : > { %v845_v19 = vsel %vm601_vm5, %v826_v25, 0.0  ;;  %v867_v13 = vmul.f32 %v826_v25, %v826_v25  ;;  %1487 = vrot.lane.b32.xlu1 %v1407_v4, %s1943_s7  ;;  %906 = vrot.lane.b32.xlu2 %v826_v25, %s1943_s7  ;;  %v1457_v24 = vadd.f32 %v1456_v60, %v1455_v11 }
 0x13a   : > { %v846_v37 = vadd.f32 %v845_v19, %v844_v1 }
 0x13b   : > { %v875_v16 = vsel %vm601_vm5, %v867_v13, 0.0 }
 0x13c   : > { %v876_v41 = vadd.f32 %v875_v16, %v874_v56 }
 0x13e   : > { %v1410_v17 = vpop.f32.mrf.mxu3 }
 0x13f   : > { %v1428_v18 = vsel %vm601_vm5, %v1410_v17, 0.0  ;;  %v1449_v21 = vmul.f32 %v1410_v17, %v1410_v17 }
 0x140   : > { %v1429_v50 = vadd.f32 %v1428_v18, %v1427_v2 }
 0x141   : > { %v1458_v52 = vsel %vm601_vm5, %v1449_v21, 0.0  ;;  %1489 = vrot.lane.b32.xlu2 %v1410_v17, %s1943_s7 }
 0x142   : > { %v1459_v43 = vadd.f32 %v1458_v52, %v1457_v24 }
 0x145   : > { %v2426_v31 = vpop.f32.mrf.mxu2 }
 0x146   : > { %v829_v23 = vpop.f32.mrf.mxu1  ;;  %v1412_v29 = vpop.f32.mrf.mxu3  ;;  %v1205_v47 = vmul.f32 %v2426_v31, %v2426_v31  ;;  %v1183_v26 = vsel %vm601_vm5, %v2426_v31, 0.0 }
 0x147   : > { %v847_v27 = vsel %vm601_vm5, %v829_v23, 0.0  ;;  %908 = vrot.lane.b32.xlu0 %v829_v23, %s1943_s7  ;;  %v2428_v35 = vpop.f32.mrf.mxu0  ;;  %v1450_v45 = vmul.f32 %v1412_v29, %v1412_v29  ;;  %v868_v48 = vmul.f32 %v829_v23, %v829_v23  ;;  %v1430_v51 = vsel %vm601_vm5, %v1412_v29, 0.0 }
 0x148   : > { %v848_v28 = vadd.f32 %v847_v27, %v846_v37  ;;  %v624_v14 = vmul.f32 %v2428_v35, %v2428_v35  ;;  %v1213_v58 = vsel %vm601_vm5, %v1205_v47, 0.0  ;;  %v1431_v61 = vadd.f32 %v1430_v51, %v1429_v50 }
 0x149   : > { %v1460_v15 = vsel %vm601_vm5, %v1450_v45, 0.0  ;;  %v877_v54 = vsel %vm601_vm5, %v868_v48, 0.0  ;;  %v602_v39 = vsel %vm601_vm5, %v2428_v35, 0.0 }
 0x14a   : > { %v1461_v59 = vadd.f32 %v1460_v15, %v1459_v43  ;;  %v632_v5 = vsel %vm601_vm5, %v624_v14, 0.0  ;;  %v878_v0 = vadd.f32 %v877_v54, %v876_v41 }
 0x14d   : > { %v2431_v33 = vpop.f32.mrf.mxu2 }
 0x14e   : > { %v831_v30 = vpop.f32.mrf.mxu1  ;;  %v1206_v8 = vmul.f32 %v2431_v33, %v2431_v33  ;;  %v1184_v20 = vsel %vm601_vm5, %v2431_v33, 0.0 }
 0x14f   : > { %1491 = vrot.lane.b32.xlu0 %v1412_v29, %s1943_s7  ;;  %910 = vrot.lane.b32.xlu1 %v831_v30, %s1943_s7  ;;  %v2433_v38 = vpop.f32.mrf.mxu0  ;;  %v869_v57 = vmul.f32 %v831_v30, %v831_v30  ;;  %v849_v12 = vsel %vm601_vm5, %v831_v30, 0.0  ;;  %v1185_v7 = vadd.f32 %v1184_v20, %v1183_v26 }
 0x150   : > { %v625_v22 = vmul.f32 %v2433_v38, %v2433_v38  ;;  %v1214_v62 = vsel %vm601_vm5, %v1206_v8, 0.0  ;;  %v603_v6 = vsel %vm601_vm5, %v2433_v38, 0.0  ;;  %v850_v60 = vadd.f32 %v849_v12, %v848_v28 }
 0x151   : > { %v879_v4 = vsel %vm601_vm5, %v869_v57, 0.0  ;;  %v1215_v25 = vadd.f32 %v1214_v62, %v1213_v58  ;;  %v604_v1 = vadd.f32 %v603_v6, %v602_v39 }
 0x152   : > { %v633_v9 = vsel %vm601_vm5, %v625_v22, 0.0  ;;  %v880_v24 = vadd.f32 %v879_v4, %v878_v0 }
 0x153   : > { %v634_v41 = vadd.f32 %v633_v9, %v632_v5 }
 0x156   : > { %v1415_v32 = vpop.f32.mrf.mxu3 }
 0x157   : > { %1493 = vrot.lane.b32.xlu1 %v1415_v32, %s1943_s7  ;;  %v1451_v3 = vmul.f32 %v1415_v32, %v1415_v32  ;;  %v1432_v10 = vsel %vm601_vm5, %v1415_v32, 0.0 }
 0x158   : > { %v1433_v17 = vadd.f32 %v1432_v10, %v1431_v61 }
 0x159   : > { %v1462_v37 = vsel %vm601_vm5, %v1451_v3, 0.0 }
 0x15a   : > { %v1463_v27 = vadd.f32 %v1462_v37, %v1461_v59 }
 0x15d   : > { %v2436_v40 = vpop.f32.mrf.mxu2 }
 0x15e   : > { %v834_v53 = vpop.f32.mrf.mxu1  ;;  %v2440_v34 = vpop.f32.mrf.mxu3  ;;  %v1207_v44 = vmul.f32 %v2436_v40, %v2436_v40  ;;  %v1186_v56 = vsel %vm601_vm5, %v2436_v40, 0.0 }
 0x15f   : > { %912 = vrot.lane.b32.xlu2 %v834_v53, %s1943_s7  ;;  %v2438_v42 = vpop.f32.mrf.mxu0  ;;  %v1452_v11 = vmul.f32 %v2440_v34, %v2440_v34  ;;  %v870_v19 = vmul.f32 %v834_v53, %v834_v53  ;;  %v1434_v16 = vsel %vm601_vm5, %v2440_v34, 0.0  ;;  %v851_v43 = vsel %vm601_vm5, %v834_v53, 0.0 }
 0x160   : > { %v1216_v18 = vsel %vm601_vm5, %v1207_v44, 0.0  ;;  %v626_v21 = vmul.f32 %v2438_v42, %v2438_v42  ;;  %v605_v52 = vsel %vm601_vm5, %v2438_v42, 0.0  ;;  %v1187_v28 = vadd.f32 %v1186_v56, %v1185_v7 }
 0x161   : > { %v1464_v50 = vsel %vm601_vm5, %v1452_v11, 0.0  ;;  %v1435_v29 = vadd.f32 %v1434_v16, %v1433_v17  ;;  %v881_v30 = vsel %vm601_vm5, %v870_v19, 0.0  ;;  %v1217_v32 = vadd.f32 %v1216_v18, %v1215_v25 }
 0x162   : > { %v1465_v51 = vadd.f32 %v1464_v50, %v1463_v27  ;;  %v606_v15 = vadd.f32 %v605_v52, %v604_v1  ;;  %v635_v8 = vsel %vm601_vm5, %v626_v21, 0.0  ;;  %v852_v14 = vadd.f32 %v851_v43, %v850_v60 }
 0x163   : > { %v882_v53 = vadd.f32 %v881_v30, %v880_v24 }
 0x165   : > { %v2443_v55 = vpop.f32.mrf.mxu2 }
 0x166   : > { %v836_v36 = vpop.f32.mrf.mxu1  ;;  %v1208_v45 = vmul.f32 %v2443_v55, %v2443_v55 }
 0x167   : > { %914 = vrot.lane.b32.xlu0 %v836_v36, %s1943_s7  ;;  %v2449_v49 = vpop.f32.mrf.mxu0  ;;  %v871_v23 = vmul.f32 %v836_v36, %v836_v36  ;;  %v853_v47 = vsel %vm601_vm5, %v836_v36, 0.0  ;;  %v1188_v36 = vsel %vm601_vm5, %v2443_v55, 0.0 }
 0x168   : > { %v627_v26 = vmul.f32 %v2449_v49, %v2449_v49  ;;  %v854_v59 = vadd.f32 %v853_v47, %v852_v14  ;;  %v1218_v6 = vsel %vm601_vm5, %v1208_v45, 0.0  ;;  %v1189_v24 = vadd.f32 %v1188_v36, %v1187_v28 }
 0x169   : > { %v883_v58 = vsel %vm601_vm5, %v871_v23, 0.0  ;;  %v1219_v16 = vadd.f32 %v1218_v6, %v1217_v32 }
 0x16a   : > { %v884_v0 = vadd.f32 %v883_v58, %v882_v53  ;;  %v637_v9 = vsel %vm601_vm5, %v627_v26, 0.0 }
 0x16e   : > { %v2445_v46 = vpop.f32.mrf.mxu3 }
 0x16f   : > { %1497 = vrot.lane.b32.xlu0 %v2445_v46, %s1943_s7  ;;  %v1436_v39 = vsel %vm601_vm5, %v2445_v46, 0.0  ;;  %v1453_v20 = vmul.f32 %v2445_v46, %v2445_v46  ;;  %v607_v46 = vsel %vm601_vm5, %v2449_v49, 0.0 }
 0x170   : > { %v1437_v10 = vadd.f32 %v1436_v39, %v1435_v29  ;;  %v608_v50 = vadd.f32 %v607_v46, %v606_v15 }
 0x171   : > { %v1466_v25 = vsel %vm601_vm5, %v1453_v20, 0.0 }
 0x172   : > { %v1467_v43 = vadd.f32 %v1466_v25, %v1465_v51 }
 0x175   : > { %v2473_v63 = vpop.f32.mrf.mxu2 }
 0x176   : > { %v2483_v2 = vpop.f32.mrf.mxu0  ;;  %v1422_v57 = vpop.f32.mrf.mxu3  ;;  %v1209_v1 = vmul.f32 %v2473_v63, %v2473_v63  ;;  %v1190_v17 = vsel %vm601_vm5, %v2473_v63, 0.0 }
 0x177   : > { %v1438_v4 = vsel %vm601_vm5, %v1422_v57, 0.0  ;;  %v1454_v44 = vmul.f32 %v1422_v57, %v1422_v57  ;;  %v628_v56 = vmul.f32 %v2483_v2, %v2483_v2  ;;  %v609_v29 = vsel %vm601_vm5, %v2483_v2, 0.0 }
 0x178   : > { %v839_v13 = vpop.f32.mrf.mxu1  ;;  %v1439_v37 = vadd.f32 %v1438_v4, %v1437_v10  ;;  %v1220_v28 = vsel %vm601_vm5, %v1209_v1, 0.0  ;;  %v1191_v45 = vadd.f32 %v1190_v17, %v1189_v24  ;;  %v610_v26 = vadd.f32 %v609_v29, %v608_v50 }
 0x179   : > { %916 = vrot.lane.b32.xlu1 %v839_v13, %s1943_s7  ;;  %v872_v48 = vmul.f32 %v839_v13, %v839_v13  ;;  %v855_v54 = vsel %vm601_vm5, %v839_v13, 0.0  ;;  %v636_v13 = vadd.f32 %v635_v8, %v634_v41  ;;  %v1468_v18 = vsel %vm601_vm5, %v1454_v44, 0.0 }
 0x17a   : > { %v856_v7 = vadd.f32 %v855_v54, %v854_v59  ;;  %v1440_v47 = vrot.slane %v1439_v37, 4  ;;  %v639_v51 = vsel %vm601_vm5, %v628_v56, 0.0  ;;  %v1221_v53 = vadd.f32 %v1220_v28, %v1219_v16 }
 0x17b   : > { %v885_v12 = vsel %vm601_vm5, %v872_v48, 0.0  ;;  %v638_v52 = vadd.f32 %v637_v9, %v636_v13  ;;  %v1469_v48 = vadd.f32 %v1468_v18, %v1467_v43 }
 0x17c   : > { %v886_v60 = vadd.f32 %v885_v12, %v884_v0  ;;  %v1441_v20 = vadd.f32 %v1440_v47, %v1439_v37 }
 0x17d   : > { %v2507_v22 = vpop.f32.mrf.mxu2 }
 0x17e   : > { %v2509_v61 = vpop.f32.mrf.mxu0  ;;  %v1210_v23 = vmul.f32 %v2507_v22, %v2507_v22  ;;  %v1192_v15 = vsel %vm601_vm5, %v2507_v22, 0.0  ;;  %v1442_v29 = vrot.slane %v1441_v20, 2 }
 0x17f   : > { %v629_v30 = vmul.f32 %v2509_v61, %v2509_v61  ;;  %v611_v8 = vsel %vm601_vm5, %v2509_v61, 0.0  ;;  %v1193_v6 = vadd.f32 %v1192_v15, %v1191_v45 }
 0x180   : > { %v841_v62 = vpop.f32.mrf.mxu1  ;;  %v1222_v58 = vsel %vm601_vm5, %v1210_v23, 0.0  ;;  %v612_v12 = vadd.f32 %v611_v8, %v610_v26 }
 0x181   : > { %v857_v3 = vsel %vm601_vm5, %v841_v62, 0.0  ;;  %v873_v5 = vmul.f32 %v841_v62, %v841_v62  ;;  %1499 = vrot.lane.b32.xlu1 %v1422_v57, %s1943_s7  ;;  %918 = vrot.lane.b32.xlu2 %v841_v62, %s1943_s7  ;;  %v641_v36 = vsel %vm601_vm5, %v629_v30, 0.0  ;;  %v640_v62 = vadd.f32 %v639_v51, %v638_v52 }
 0x182   : > { %v858_v19 = vadd.f32 %v857_v3, %v856_v7  ;;  %v1470_v3 = vrot.slane %v1469_v48, 4 }
 0x183   : > { %v887_v11 = vsel %vm601_vm5, %v873_v5, 0.0  ;;  %v1223_v5 = vadd.f32 %v1222_v58, %v1221_v53  ;;  %v642_v44 = vadd.f32 %v641_v36, %v640_v62  ;;  %v1443_v58 = vadd.f32 %v1442_v29, %v1441_v20 }
 0x184   : > { %v888_v21 = vadd.f32 %v887_v11, %v886_v60  ;;  %v859_v32 = vrot.slane %v858_v19, 4  ;;  %v1471_v16 = vadd.f32 %v1470_v3, %v1469_v48 }
 0x186   : > { %v889_v14 = vrot.slane %v888_v21, 4  ;;  %v1472_v15 = vrot.slane %v1471_v16, 2 }
 0x187   : > { %v2537_v27 = vpop.f32.mrf.mxu0  ;;  %v2539_v41 = vpop.f32.mrf.mxu2 }
 0x188   : > { %v630_v57 = vmul.f32 %v2537_v27, %v2537_v27  ;;  %v1211_v54 = vmul.f32 %v2539_v41, %v2539_v41  ;;  %v613_v59 = vsel %vm601_vm5, %v2537_v27, 0.0  ;;  %v1194_v39 = vsel %vm601_vm5, %v2539_v41, 0.0 }
 0x189   : > { %1495 = vrot.lane.b32.xlu2 %v2440_v34, %s1943_s7  ;;  %v860_v34 = vadd.f32 %v859_v32, %v858_v19  ;;  %v890_v0 = vadd.f32 %v889_v14, %v888_v21  ;;  %v614_v7 = vadd.f32 %v613_v59, %v612_v12  ;;  %v1195_v46 = vadd.f32 %v1194_v39, %v1193_v6 }
 0x18a   : > { %v643_v4 = vsel %vm601_vm5, %v630_v57, 0.0  ;;  %v1224_v9 = vsel %vm601_vm5, %v1211_v54, 0.0 }
 0x18b   : > { %v861_v25 = vrot.slane %v860_v34, 2  ;;  %v644_v13 = vadd.f32 %v643_v4, %v642_v44  ;;  %v891_v17 = vrot.slane %v890_v0, 2  ;;  %v1225_v18 = vadd.f32 %v1224_v9, %v1223_v5 }
 0x18d   : > { %v862_v45 = vadd.f32 %v861_v25, %v860_v34  ;;  %v892_v14 = vadd.f32 %v891_v17, %v890_v0 }
 0x18f   : > { %v2565_v10 = vpop.f32.mrf.mxu0  ;;  %v2567_v11 = vpop.f32.mrf.mxu2  ;;  %v863_v36 = vrot.slane %v862_v45, 1  ;;  %v893_v6 = vrot.slane %v892_v14, 1 }
 0x190   : > { %v615_v1 = vsel %vm601_vm5, %v2565_v10, 0.0  ;;  %v631_v60 = vmul.f32 %v2565_v10, %v2565_v10  ;;  %v1196_v19 = vsel %vm601_vm5, %v2567_v11, 0.0  ;;  %v1212_v56 = vmul.f32 %v2567_v11, %v2567_v11 }
 0x191   : > { %v616_v24 = vadd.f32 %v615_v1, %v614_v7  ;;  %v1197_v37 = vadd.f32 %v1196_v19, %v1195_v46  ;;  %v1444_v7 = vrot.slane %v1443_v58, 1  ;;  %v864_v20 = vadd.f32 %v863_v36, %v862_v45 }
 0x192   : > { %v645_v21 = vsel %vm601_vm5, %v631_v60, 0.0  ;;  %v1226_v23 = vsel %vm601_vm5, %v1212_v56, 0.0  ;;  %v894_v60 = vadd.f32 %v893_v6, %v892_v14 }
 0x193   : > { %v617_v50 = vrot.slane %v616_v24, 4  ;;  %v646_v52 = vadd.f32 %v645_v21, %v644_v13  ;;  %v1198_v43 = vrot.slane %v1197_v37, 4  ;;  %v907_v28 = vpop.permute.xlu2 %906  ;;  %v1227_v30 = vadd.f32 %v1226_v23, %v1225_v18 }
 0x194   : > { %v929_v32 = vsel %vm601_vm5, %v2433_v38, %v907_v28  ;;  %v1473_v38 = vadd.f32 %v1472_v15, %v1471_v16 }
 0x195   : > { %v618_v47 = vadd.f32 %v617_v50, %v616_v24  ;;  %v647_v48 = vrot.slane %v646_v52, 4  ;;  %v1199_v51 = vadd.f32 %v1198_v43, %v1197_v37  ;;  %937 = vst.msk [vmem:[%s2582_s11 + $0x10] sm:$0xff] %vm330_vm0, %v929_v32  ;;  %v1228_v8 = vrot.slane %v1227_v30, 4 }
 0x196   : > { %v1474_v25 = vrot.slane %v1473_v38, 1  ;;  %v1445_v37 = vadd.f32 %v1444_v7, %v1443_v58 }
 0x197   : > { %v619_v57 = vrot.slane %v618_v47, 2  ;;  %v648_v53 = vadd.f32 %v647_v48, %v646_v52  ;;  %v1200_v26 = vrot.slane %v1199_v51, 2  ;;  %v1229_v54 = vadd.f32 %v1228_v8, %v1227_v30 }
 0x198   : > { %v1475_v21 = vadd.f32 %v1474_v25, %v1473_v38 }
 0x199   : > { %v620_v59 = vadd.f32 %v619_v57, %v618_v47  ;;  %v649_v39 = vrot.slane %v648_v53, 2  ;;  %v1201_v62 = vadd.f32 %v1200_v26, %v1199_v51  ;;  %v1230_v34 = vrot.slane %v1229_v54, 2 }
 0x19b   : > { %v621_v12 = vrot.slane %v620_v59, 1  ;;  %v650_v3 = vadd.f32 %v649_v39, %v648_v53  ;;  %v1202_v5 = vrot.slane %v1201_v62, 1  ;;  %v1490_v4 = vpop.permute.xlu2 %1489  ;;  %v1231_v44 = vadd.f32 %v1230_v34, %v1229_v54 }
 0x19c   : > { %v1511_v0 = vsel %vm601_vm5, %v2436_v40, %v1490_v4 }
 0x19d   : > { %v622_v46 = vadd.f32 %v621_v12, %v620_v59  ;;  %v651_v9 = vrot.slane %v650_v3, 1  ;;  %1697 = vst.msk [vmem:[%s2582_s11 + $0x28] sm:$0xff] %vm330_vm0, %v1511_v0  ;;  %v1232_v1 = vrot.slane %v1231_v44, 1  ;;  %v1203_v24 = vadd.f32 %v1202_v5, %v1201_v62 }
 0x19f   : > { %v652_v19 = vadd.f32 %v651_v9, %v650_v3  ;;  %v865_v13 = vadd.f32 %v864_v20, %v622_v46  ;;  %v1233_v17 = vadd.f32 %v1232_v1, %v1231_v44 }
 0x1a0   : > { %v1486_v40 = vpop.permute.xlu0 %1485 }
 0x1a1   : > { %v895_v56 = vadd.f32 %v894_v60, %v652_v19  ;;  %v1204_v16 = vadd.f32 %v1203_v24, %v865_v13  ;;  %v1509_v18 = vsel %vm601_vm5, %v2426_v31, %v1486_v40 }
 0x1a2   : > { %1695 = vst.msk [vmem:[%s2582_s11 + $0x8] sm:$0xff] %vm330_vm0, %v1509_v18 }
 0x1a3   : > { %v1234_v50 = vadd.f32 %v1233_v17, %v895_v56  ;;  %v1446_v52 = vadd.f32 %v1445_v37, %v1204_v16  ;;  %v905_v43 = vpop.permute.xlu1 %904 }
 0x1a4   : > { %v928_v23 = vsel %vm601_vm5, %v2428_v35, %v905_v43 }
 0x1a5   : > { %v1476_v28 = vadd.f32 %v1475_v21, %v1234_v50  ;;  %936 = vst.msk [vmem:[%s2582_s11] sm:$0xff] %vm330_vm0, %v928_v23 }
 0x1a7   : > { %v1527_v31 = vsel %vm1526_vm6, %v1446_v52, %v1476_v28 }
 0x1a8   : > { %1529 = vst.msk [vmem:[%s276_s22] sm:$0x3] %vm1528_vm7, %v1527_v31 }
 0x1ab   : > { %v1488_v29 = vpop.permute.xlu1 %1487 }
 0x1ac   : > { %v1510_v30 = vsel %vm601_vm5, %v2431_v33, %v1488_v29 }
 0x1ad   : > { %1696 = vst.msk [vmem:[%s2582_s11 + $0x18] sm:$0xff] %vm330_vm0, %v1510_v30 }
 0x1b9   : > { %v909_v35 = vpop.permute.xlu0 %908  ;;  %v913_v45 = vpop.permute.xlu2 %912 }
 0x1ba   : > { %v930_v32 = vsel %vm601_vm5, %v2438_v42, %v909_v35  ;;  %v932_v47 = vsel %vm601_vm5, %v2483_v2, %v913_v45 }
 0x1bb   : > { %938 = vst.msk [vmem:[%s2582_s11 + $0x20] sm:$0xff] %vm330_vm0, %v930_v32 }
 0x1bc   : > { %940 = vst.msk [vmem:[%s2582_s11 + $0x40] sm:$0xff] %vm330_vm0, %v932_v47 }
 0x1c1   : > { %v1492_v48 = vpop.permute.xlu0 %1491  ;;  %v911_v51 = vpop.permute.xlu1 %910 }
 0x1c2   : > { %v1512_v33 = vsel %vm601_vm5, %v2443_v55, %v1492_v48  ;;  %v931_v15 = vsel %vm601_vm5, %v2449_v49, %v911_v51 }
 0x1c3   : > { %1698 = vst.msk [vmem:[%s2582_s11 + $0x38] sm:$0xff] %vm330_vm0, %v1512_v33 }
 0x1c4   : > { %939 = vst.msk [vmem:[%s2582_s11 + $0x30] sm:$0xff] %vm330_vm0, %v931_v15 }
 0x1c9   : > { %v1494_v42 = vpop.permute.xlu1 %1493 }
 0x1ca   : > { %v1513_v2 = vsel %vm601_vm5, %v2473_v63, %v1494_v42 }
 0x1cb   : > { %1699 = vst.msk [vmem:[%s2582_s11 + $0x48] sm:$0xff] %vm330_vm0, %v1513_v2 }
 0x1d9   : > { %v915_v8 = vpop.permute.xlu0 %914 }
 0x1da   : > { %v933_v55 = vsel %vm601_vm5, %v2509_v61, %v915_v8 }
 0x1db   : > { %v919_v14 = vpop.permute.xlu2 %918  ;;  %941 = vst.msk [vmem:[%s2582_s11 + $0x50] sm:$0xff] %vm330_vm0, %v933_v55 }
 0x1dc   : > { %v935_v49 = vsel %vm601_vm5, %v2565_v10, %v919_v14 }
 0x1dd   : > { %943 = vst.msk [vmem:[%s2582_s11 + $0x70] sm:$0xff] %vm330_vm0, %v935_v49 }
 0x1e1   : > { %v1498_v57 = vpop.permute.xlu0 %1497 }
 0x1e2   : > { %v1515_v63 = vsel %vm601_vm5, %v2539_v41, %v1498_v57 }
 0x1e3   : > { %v1496_v53 = vpop.permute.xlu2 %1495  ;;  %1701 = vst.msk [vmem:[%s2582_s11 + $0x68] sm:$0xff] %vm330_vm0, %v1515_v63 }
 0x1e4   : > { %v1514_v26 = vsel %vm601_vm5, %v2507_v22, %v1496_v53 }
 0x1e5   : > { %1700 = vst.msk [vmem:[%s2582_s11 + $0x58] sm:$0xff] %vm330_vm0, %v1514_v26 }
 0x1eb   : > { %v917_v61 = vpop.permute.xlu1 %916 }
 0x1ec   : > { %v934_v58 = vsel %vm601_vm5, %v2537_v27, %v917_v61 }
 0x1ed   : > { %942 = vst.msk [vmem:[%s2582_s11 + $0x60] sm:$0xff] %vm330_vm0, %v934_v58 }
 0x1f3   : > { %v1500_v10 = vpop.permute.xlu1 %1499 }
 0x1f4   : > { %v1516_v54 = vsel %vm601_vm5, %v2567_v11, %v1500_v10 }
 0x1f5   : > { %1702 = vst.msk [vmem:[%s2582_s11 + $0x78] sm:$0xff] %vm330_vm0, %v1516_v54 }
 0x1f6 PF: > { %s17_s21 = sadd.s32 1, %s1937_s21  }
 0x1f7   : > { %p14_p4 = scmp.ge.s32.totalorder %s17_s21, 4  }
 0x1f9   :  { %16 = sbr.rel (!%p14_p4) target bundleno = 1 (0x1), region = 91 }

</bundles_post_ra>
